<compile_context>
chip_gen: v6e
topology: v6e:2x2x1
jax: 0.10.0
libtpu: 0.0.40
codegen_flags: <defaults>
</compile_context>

<pallas_src>
import jax
import jax.numpy as jnp
import numpy as np
from jax.experimental import pallas as pl
from jax.experimental.pallas import tpu as pltpu


def encoder_kernel(ids_ref, table_ref,
                   w_ih0_ref, w_hh0_ref, gib0_ref, bhn0_ref,
                   w_ih1_ref, w_hh1_ref, gib1_ref, bhn1_ref,
                   out_ref, hid_ref, out0_s):
    """Fused embedding + 2-layer GRU forward (single invocation, no grid).

    ids_ref:   (S*B, 1) int32, time-major flattened token ids (row t*B + b)
    table_ref: (V, E)   embedding table
    w_ih*_ref: (Din, 3H) input->hidden weights (gate order r, z, n)
    w_hh*_ref: (H, 3H)   hidden->hidden weights
    gib*_ref:  (1, 3H)   b_ih with b_hh folded in for the r/z gates
    bhn*_ref:  (1, H)    b_hh for the n gate (kept inside the r*(.) term)
    out_ref:   (S*B, H)  layer-1 outputs, time-major flat
    hid_ref:   (2, B, H) final hidden state per layer
    out0_s:    VMEM (S*B, H) scratch for layer-0 outputs
    """
    SB = ids_ref.shape[0]
    V = table_ref.shape[0]
    H = w_hh0_ref.shape[0]
    B = hid_ref.shape[1]
    S = SB // B

    # ---- Embedding: one-hot (SB, V) x (V, E) matmul on the MXU ----
    ids = ids_ref[...]                                             # (SB, 1) int32
    vocab_iota = jax.lax.broadcasted_iota(jnp.int32, (SB, V), 1)   # (SB, V)
    one_hot = (vocab_iota == ids).astype(jnp.float32)
    emb = jnp.dot(one_hot, table_ref[...],
                  preferred_element_type=jnp.float32)              # (SB, E)

    def gru_step(gi_t, h_prev, w_hh, b_hh_n):
        # gi_t already holds x@W_ih + b_ih (+ b_hh for the r/z gates).
        gh = jnp.dot(h_prev, w_hh, preferred_element_type=jnp.float32)   # (B, 3H)
        r = jax.nn.sigmoid(gi_t[:, 0:H] + gh[:, 0:H])
        z = jax.nn.sigmoid(gi_t[:, H:2 * H] + gh[:, H:2 * H])
        n = jnp.tanh(gi_t[:, 2 * H:3 * H] + r * (gh[:, 2 * H:3 * H] + b_hh_n))
        return (1.0 - z) * n + z * h_prev

    # ---- Layer 0: hoisted input projection (one big MXU matmul) ----
    gi0 = jnp.dot(emb, w_ih0_ref[...],
                  preferred_element_type=jnp.float32) + gib0_ref[...]    # (SB, 3H)
    w_hh0 = w_hh0_ref[...]
    bhn0 = bhn0_ref[...]
    h0 = jnp.zeros((B, H), jnp.float32)
    # S is small & static -> fully unrolled loop, all slices/stores static.
    # TODO(synk): for long sequences switch to lax.fori_loop + pl.ds indexing.
    for t in range(S):
        h0 = gru_step(gi0[t * B:(t + 1) * B, :], h0, w_hh0, bhn0)
        out0_s[t * B:(t + 1) * B, :] = h0

    # ---- Layer 1: input projection hoisted over the full layer-0 output ----
    # (dropout p=0.2 between layers intentionally omitted: eval-mode forward)
    gi1 = jnp.dot(out0_s[...], w_ih1_ref[...],
                  preferred_element_type=jnp.float32) + gib1_ref[...]    # (SB, 3H)
    w_hh1 = w_hh1_ref[...]
    bhn1 = bhn1_ref[...]
    h1 = jnp.zeros((B, H), jnp.float32)
    for t in range(S):
        h1 = gru_step(gi1[t * B:(t + 1) * B, :], h1, w_hh1, bhn1)
        out_ref[t * B:(t + 1) * B, :] = h1

    # Final hidden states, written once at the end.
    hid_ref[0] = h0
    hid_ref[1] = h1


def _fold_gru_biases(b_ih, b_hh, hidden_dim):
    """Fold b_hh into the hoisted input projection for the r/z gates.

    Returns (gi_bias (1,3H), b_hh_n (1,H)). The n gate keeps its recurrent
    bias separate because PyTorch applies it inside the r * (...) term.
    """
    zeros_n = jnp.zeros((1, hidden_dim), jnp.float32)
    gi_bias = b_ih + jnp.concatenate([b_hh[:, :2 * hidden_dim], zeros_n], axis=1)
    b_hh_n = b_hh[:, 2 * hidden_dim:]
    return gi_bias, b_hh_n


@jax.jit
def encoder_forward(params, x):
    """x: (batch, seq) int32 token ids.

    Returns (outputs (batch, seq, hidden), hidden (2, batch, hidden)),
    matching nn.GRU(batch_first=True, num_layers=2) in eval mode.
    """
    B, S = x.shape
    H = params["w_hh_l0"].shape[0]

    gib0, bhn0 = _fold_gru_biases(params["b_ih_l0"], params["b_hh_l0"], H)
    gib1, bhn1 = _fold_gru_biases(params["b_ih_l1"], params["b_hh_l1"], H)

    # Time-major flattened ids: row t*B + b holds token x[b, t].
    ids_tm = jnp.transpose(x.astype(jnp.int32), (1, 0)).reshape(S * B, 1)

    vmem = pltpu.MemorySpace.VMEM
    out_flat, hidden = pl.pallas_call(
        encoder_kernel,
        out_shape=(jax.ShapeDtypeStruct((S * B, H), jnp.float32),
                   jax.ShapeDtypeStruct((2, B, H), jnp.float32)),
        in_specs=[pl.BlockSpec(memory_space=vmem)] * 10,
        out_specs=(pl.BlockSpec(memory_space=vmem),
                   pl.BlockSpec(memory_space=vmem)),
        scratch_shapes=[pltpu.VMEM((S * B, H), jnp.float32)],
    )(ids_tm, params["embedding"],
      params["w_ih_l0"], params["w_hh_l0"], gib0, bhn0,
      params["w_ih_l1"], params["w_hh_l1"], gib1, bhn1)

    outputs = jnp.transpose(out_flat.reshape(S, B, H), (1, 0, 2))   # (B, S, H)
    return outputs, hidden


def init_params(key, input_size, embedding_dim, hidden_dim):
    """Deterministic parameter init mirroring nn.Embedding / nn.GRU shapes."""
    ks = jax.random.split(key, 9)
    k = 1.0 / jnp.sqrt(hidden_dim)
    params = {
        # nn.Embedding: N(0, 1)
        "embedding": jax.random.normal(ks[0], (input_size, embedding_dim),
                                       jnp.float32),
        # layer 0 (input = embedding_dim); weights stored transposed (Din, 3H)
        "w_ih_l0": jax.random.uniform(ks[1], (embedding_dim, 3 * hidden_dim),
                                      jnp.float32, -k, k),
        "w_hh_l0": jax.random.uniform(ks[2], (hidden_dim, 3 * hidden_dim),
                                      jnp.float32, -k, k),
        "b_ih_l0": jax.random.uniform(ks[3], (1, 3 * hidden_dim),
                                      jnp.float32, -k, k),
        "b_hh_l0": jax.random.uniform(ks[4], (1, 3 * hidden_dim),
                                      jnp.float32, -k, k),
        # layer 1 (input = hidden_dim)
        "w_ih_l1": jax.random.uniform(ks[5], (hidden_dim, 3 * hidden_dim),
                                      jnp.float32, -k, k),
        "w_hh_l1": jax.random.uniform(ks[6], (hidden_dim, 3 * hidden_dim),
                                      jnp.float32, -k, k),
        "b_ih_l1": jax.random.uniform(ks[7], (1, 3 * hidden_dim),
                                      jnp.float32, -k, k),
        "b_hh_l1": jax.random.uniform(ks[8], (1, 3 * hidden_dim),
                                      jnp.float32, -k, k),
    }
    return params


# ---------------- pure-JAX reference (PyTorch GRU eval semantics) ----------------
def _gru_layer_ref(x_sbf, w_ih, w_hh, b_ih, b_hh):
    H = w_hh.shape[0]

    def step(h, x_t):
        gi = jnp.dot(x_t, w_ih, precision=jax.lax.Precision.HIGHEST) + b_ih
        gh = jnp.dot(h, w_hh, precision=jax.lax.Precision.HIGHEST) + b_hh
        r = jax.nn.sigmoid(gi[:, :H] + gh[:, :H])
        z = jax.nn.sigmoid(gi[:, H:2 * H] + gh[:, H:2 * H])
        n = jnp.tanh(gi[:, 2 * H:] + r * gh[:, 2 * H:])
        h_new = (1.0 - z) * n + z * h
        return h_new, h_new

    h0 = jnp.zeros((x_sbf.shape[1], H), jnp.float32)
    h_final, outs = jax.lax.scan(step, h0, x_sbf)
    return outs, h_final


def encoder_reference(params, x):
    emb = params["embedding"][x]                      # (B, S, E)
    x_sbf = jnp.transpose(emb, (1, 0, 2))             # (S, B, E)
    out0, h0 = _gru_layer_ref(x_sbf, params["w_ih_l0"], params["w_hh_l0"],
                              params["b_ih_l0"], params["b_hh_l0"])
    out1, h1 = _gru_layer_ref(out0, params["w_ih_l1"], params["w_hh_l1"],
                              params["b_ih_l1"], params["b_hh_l1"])
    return jnp.transpose(out1, (1, 0, 2)), jnp.stack([h0, h1], axis=0)


if __name__ == "__main__":
    INPUT_SIZE = 20      # vocab size
    EMBEDDING_DIM = 16
    HIDDEN_DIM = 32
    BATCH = 2
    SEQ = 8

    key = jax.random.PRNGKey(0)
    pkey, xkey = jax.random.split(key)
    params = init_params(pkey, INPUT_SIZE, EMBEDDING_DIM, HIDDEN_DIM)
    x = jax.random.randint(xkey, (BATCH, SEQ), 0, INPUT_SIZE, dtype=jnp.int32)

    outputs, hidden = encoder_forward(params, x)
    jax.block_until_ready((outputs, hidden))

    assert outputs.shape == (BATCH, SEQ, HIDDEN_DIM)
    assert hidden.shape == (2, BATCH, HIDDEN_DIM)

    ref_out, ref_hid = encoder_reference(params, x)
    np.testing.assert_allclose(np.asarray(outputs), np.asarray(ref_out),
                               rtol=1e-3, atol=1e-3)
    np.testing.assert_allclose(np.asarray(hidden), np.asarray(ref_hid),
                               rtol=1e-3, atol=1e-3)

    print("KERNEL_OK")
</pallas_src>

<mosaic_0001>
module attributes {stable_mosaic.version = 11 : i64} {
  func.func @encoder_kernel(%arg0: memref<16x1xi32, #tpu.memory_space<vmem>>, %arg1: memref<20x16xf32, #tpu.memory_space<vmem>>, %arg2: memref<16x96xf32, #tpu.memory_space<vmem>>, %arg3: memref<32x96xf32, #tpu.memory_space<vmem>>, %arg4: memref<1x96xf32, #tpu.memory_space<vmem>>, %arg5: memref<1x32xf32, #tpu.memory_space<vmem>>, %arg6: memref<32x96xf32, #tpu.memory_space<vmem>>, %arg7: memref<32x96xf32, #tpu.memory_space<vmem>>, %arg8: memref<1x96xf32, #tpu.memory_space<vmem>>, %arg9: memref<1x32xf32, #tpu.memory_space<vmem>>, %arg10: memref<16x32xf32, #tpu.memory_space<vmem>>, %arg11: memref<2x2x32xf32, #tpu.memory_space<vmem>>, %arg12: memref<16x32xf32, #tpu.memory_space<vmem>>) attributes {dimension_semantics = [], scalar_prefetch = 0 : i64, scratch_operands = 1 : i64, tpu.core_type = #tpu.core_type<tc>} {
    %c0 = arith.constant 0 : index
    %c0_0 = arith.constant 0 : index
    %0 = vector.load %arg0[%c0, %c0_0] : memref<16x1xi32, #tpu.memory_space<vmem>>, vector<16x1xi32>
    %1 = tpu.iota {dimensions = array<i32: 1>} : vector<16x20xi32>
    %2 = vector.broadcast %0 : vector<16x1xi32> to vector<16x20xi32>
    %3 = arith.cmpi eq, %1, %2 : vector<16x20xi32>
    %4 = arith.extui %3 : vector<16x20xi1> to vector<16x20xi32>
    %5 = arith.sitofp %4 : vector<16x20xi32> to vector<16x20xf32>
    %c0_1 = arith.constant 0 : index
    %c0_2 = arith.constant 0 : index
    %6 = vector.load %arg1[%c0_1, %c0_2] : memref<20x16xf32, #tpu.memory_space<vmem>>, vector<20x16xf32>
    %cst = arith.constant dense<0.000000e+00> : vector<16x16xf32>
    %7 = tpu.matmul %5, %6, %cst {dimension_numbers = #tpu.dot_dimension_numbers<[1], [0], [0], [1], [0, 0, 1, 1], [], []>} : vector<16x20xf32>, vector<20x16xf32>, vector<16x16xf32> -> vector<16x16xf32>
    %c0_3 = arith.constant 0 : index
    %c0_4 = arith.constant 0 : index
    %8 = vector.load %arg2[%c0_3, %c0_4] : memref<16x96xf32, #tpu.memory_space<vmem>>, vector<16x96xf32>
    %cst_5 = arith.constant dense<0.000000e+00> : vector<16x96xf32>
    %9 = tpu.matmul %7, %8, %cst_5 {dimension_numbers = #tpu.dot_dimension_numbers<[1], [0], [0], [1], [0, 0, 1, 1], [], []>} : vector<16x16xf32>, vector<16x96xf32>, vector<16x96xf32> -> vector<16x96xf32>
    %c0_6 = arith.constant 0 : index
    %c0_7 = arith.constant 0 : index
    %10 = vector.load %arg4[%c0_6, %c0_7] : memref<1x96xf32, #tpu.memory_space<vmem>>, vector<1x96xf32>
    %11 = vector.broadcast %10 : vector<1x96xf32> to vector<16x96xf32>
    %12 = arith.addf %9, %11 : vector<16x96xf32>
    %c0_8 = arith.constant 0 : index
    %c0_9 = arith.constant 0 : index
    %13 = vector.load %arg3[%c0_8, %c0_9] : memref<32x96xf32, #tpu.memory_space<vmem>>, vector<32x96xf32>
    %c0_10 = arith.constant 0 : index
    %c0_11 = arith.constant 0 : index
    %14 = vector.load %arg5[%c0_10, %c0_11] : memref<1x32xf32, #tpu.memory_space<vmem>>, vector<1x32xf32>
    %cst_12 = arith.constant 0.000000e+00 : f32
    %15 = vector.broadcast %cst_12 : f32 to vector<2x32xf32>
    %16 = vector.extract_strided_slice %12 {offsets = [0, 0], sizes = [2, 96], strides = [1, 1]} : vector<16x96xf32> to vector<2x96xf32>
    %cst_13 = arith.constant dense<0.000000e+00> : vector<2x96xf32>
    %17 = tpu.matmul %15, %13, %cst_13 {dimension_numbers = #tpu.dot_dimension_numbers<[1], [0], [0], [1], [0, 0, 1, 1], [], []>} : vector<2x32xf32>, vector<32x96xf32>, vector<2x96xf32> -> vector<2x96xf32>
    %18 = vector.extract_strided_slice %16 {offsets = [0, 0], sizes = [2, 32], strides = [1, 1]} : vector<2x96xf32> to vector<2x32xf32>
    %19 = vector.extract_strided_slice %17 {offsets = [0, 0], sizes = [2, 32], strides = [1, 1]} : vector<2x96xf32> to vector<2x32xf32>
    %20 = arith.addf %18, %19 : vector<2x32xf32>
    %21 = arith.negf %20 : vector<2x32xf32>
    %22 = math.exp %21 : vector<2x32xf32>
    %cst_14 = arith.constant 1.000000e+00 : f32
    %23 = vector.broadcast %cst_14 : f32 to vector<2x32xf32>
    %24 = arith.addf %23, %22 : vector<2x32xf32>
    %25 = arith.divf %23, %24 : vector<2x32xf32>
    %26 = vector.extract_strided_slice %16 {offsets = [0, 32], sizes = [2, 32], strides = [1, 1]} : vector<2x96xf32> to vector<2x32xf32>
    %27 = vector.extract_strided_slice %17 {offsets = [0, 32], sizes = [2, 32], strides = [1, 1]} : vector<2x96xf32> to vector<2x32xf32>
    %28 = arith.addf %26, %27 : vector<2x32xf32>
    %29 = arith.negf %28 : vector<2x32xf32>
    %30 = math.exp %29 : vector<2x32xf32>
    %cst_15 = arith.constant 1.000000e+00 : f32
    %31 = vector.broadcast %cst_15 : f32 to vector<2x32xf32>
    %32 = arith.addf %31, %30 : vector<2x32xf32>
    %33 = arith.divf %31, %32 : vector<2x32xf32>
    %34 = vector.extract_strided_slice %16 {offsets = [0, 64], sizes = [2, 32], strides = [1, 1]} : vector<2x96xf32> to vector<2x32xf32>
    %35 = vector.extract_strided_slice %17 {offsets = [0, 64], sizes = [2, 32], strides = [1, 1]} : vector<2x96xf32> to vector<2x32xf32>
    %36 = vector.broadcast %14 : vector<1x32xf32> to vector<2x32xf32>
    %37 = arith.addf %35, %36 : vector<2x32xf32>
    %38 = arith.mulf %25, %37 : vector<2x32xf32>
    %39 = arith.addf %34, %38 : vector<2x32xf32>
    %40 = math.tanh %39 : vector<2x32xf32>
    %cst_16 = arith.constant 1.000000e+00 : f32
    %41 = vector.broadcast %cst_16 : f32 to vector<2x32xf32>
    %42 = arith.subf %41, %33 : vector<2x32xf32>
    %43 = arith.mulf %42, %40 : vector<2x32xf32>
    %44 = arith.mulf %33, %15 : vector<2x32xf32>
    %45 = arith.addf %43, %44 : vector<2x32xf32>
    %c0_17 = arith.constant 0 : index
    %c0_18 = arith.constant 0 : index
    %46 = vector.load %arg12[%c0_17, %c0_18] : memref<16x32xf32, #tpu.memory_space<vmem>>, vector<2x32xf32>
    tpu.vector_store %arg12[%c0_17, %c0_18], %45 {strides = array<i32>} : memref<16x32xf32, #tpu.memory_space<vmem>>, vector<2x32xf32>,
    %47 = vector.extract_strided_slice %12 {offsets = [2, 0], sizes = [2, 96], strides = [1, 1]} : vector<16x96xf32> to vector<2x96xf32>
    %cst_19 = arith.constant dense<0.000000e+00> : vector<2x96xf32>
    %48 = tpu.matmul %45, %13, %cst_19 {dimension_numbers = #tpu.dot_dimension_numbers<[1], [0], [0], [1], [0, 0, 1, 1], [], []>} : vector<2x32xf32>, vector<32x96xf32>, vector<2x96xf32> -> vector<2x96xf32>
    %49 = vector.extract_strided_slice %47 {offsets = [0, 0], sizes = [2, 32], strides = [1, 1]} : vector<2x96xf32> to vector<2x32xf32>
    %50 = vector.extract_strided_slice %48 {offsets = [0, 0], sizes = [2, 32], strides = [1, 1]} : vector<2x96xf32> to vector<2x32xf32>
    %51 = arith.addf %49, %50 : vector<2x32xf32>
    %52 = arith.negf %51 : vector<2x32xf32>
    %53 = math.exp %52 : vector<2x32xf32>
    %cst_20 = arith.constant 1.000000e+00 : f32
    %54 = vector.broadcast %cst_20 : f32 to vector<2x32xf32>
    %55 = arith.addf %54, %53 : vector<2x32xf32>
    %56 = arith.divf %54, %55 : vector<2x32xf32>
    %57 = vector.extract_strided_slice %47 {offsets = [0, 32], sizes = [2, 32], strides = [1, 1]} : vector<2x96xf32> to vector<2x32xf32>
    %58 = vector.extract_strided_slice %48 {offsets = [0, 32], sizes = [2, 32], strides = [1, 1]} : vector<2x96xf32> to vector<2x32xf32>
    %59 = arith.addf %57, %58 : vector<2x32xf32>
    %60 = arith.negf %59 : vector<2x32xf32>
    %61 = math.exp %60 : vector<2x32xf32>
    %cst_21 = arith.constant 1.000000e+00 : f32
    %62 = vector.broadcast %cst_21 : f32 to vector<2x32xf32>
    %63 = arith.addf %62, %61 : vector<2x32xf32>
    %64 = arith.divf %62, %63 : vector<2x32xf32>
    %65 = vector.extract_strided_slice %47 {offsets = [0, 64], sizes = [2, 32], strides = [1, 1]} : vector<2x96xf32> to vector<2x32xf32>
    %66 = vector.extract_strided_slice %48 {offsets = [0, 64], sizes = [2, 32], strides = [1, 1]} : vector<2x96xf32> to vector<2x32xf32>
    %67 = vector.broadcast %14 : vector<1x32xf32> to vector<2x32xf32>
    %68 = arith.addf %66, %67 : vector<2x32xf32>
    %69 = arith.mulf %56, %68 : vector<2x32xf32>
    %70 = arith.addf %65, %69 : vector<2x32xf32>
    %71 = math.tanh %70 : vector<2x32xf32>
    %cst_22 = arith.constant 1.000000e+00 : f32
    %72 = vector.broadcast %cst_22 : f32 to vector<2x32xf32>
    %73 = arith.subf %72, %64 : vector<2x32xf32>
    %74 = arith.mulf %73, %71 : vector<2x32xf32>
    %75 = arith.mulf %64, %45 : vector<2x32xf32>
    %76 = arith.addf %74, %75 : vector<2x32xf32>
    %c2 = arith.constant 2 : index
    %c0_23 = arith.constant 0 : index
    %77 = vector.load %arg12[%c2, %c0_23] : memref<16x32xf32, #tpu.memory_space<vmem>>, vector<2x32xf32>
    tpu.vector_store %arg12[%c2, %c0_23], %76 {strides = array<i32>} : memref<16x32xf32, #tpu.memory_space<vmem>>, vector<2x32xf32>,
    %78 = vector.extract_strided_slice %12 {offsets = [4, 0], sizes = [2, 96], strides = [1, 1]} : vector<16x96xf32> to vector<2x96xf32>
    %cst_24 = arith.constant dense<0.000000e+00> : vector<2x96xf32>
    %79 = tpu.matmul %76, %13, %cst_24 {dimension_numbers = #tpu.dot_dimension_numbers<[1], [0], [0], [1], [0, 0, 1, 1], [], []>} : vector<2x32xf32>, vector<32x96xf32>, vector<2x96xf32> -> vector<2x96xf32>
    %80 = vector.extract_strided_slice %78 {offsets = [0, 0], sizes = [2, 32], strides = [1, 1]} : vector<2x96xf32> to vector<2x32xf32>
    %81 = vector.extract_strided_slice %79 {offsets = [0, 0], sizes = [2, 32], strides = [1, 1]} : vector<2x96xf32> to vector<2x32xf32>
    %82 = arith.addf %80, %81 : vector<2x32xf32>
    %83 = arith.negf %82 : vector<2x32xf32>
    %84 = math.exp %83 : vector<2x32xf32>
    %cst_25 = arith.constant 1.000000e+00 : f32
    %85 = vector.broadcast %cst_25 : f32 to vector<2x32xf32>
    %86 = arith.addf %85, %84 : vector<2x32xf32>
    %87 = arith.divf %85, %86 : vector<2x32xf32>
    %88 = vector.extract_strided_slice %78 {offsets = [0, 32], sizes = [2, 32], strides = [1, 1]} : vector<2x96xf32> to vector<2x32xf32>
    %89 = vector.extract_strided_slice %79 {offsets = [0, 32], sizes = [2, 32], strides = [1, 1]} : vector<2x96xf32> to vector<2x32xf32>
    %90 = arith.addf %88, %89 : vector<2x32xf32>
    %91 = arith.negf %90 : vector<2x32xf32>
    %92 = math.exp %91 : vector<2x32xf32>
    %cst_26 = arith.constant 1.000000e+00 : f32
    %93 = vector.broadcast %cst_26 : f32 to vector<2x32xf32>
    %94 = arith.addf %93, %92 : vector<2x32xf32>
    %95 = arith.divf %93, %94 : vector<2x32xf32>
    %96 = vector.extract_strided_slice %78 {offsets = [0, 64], sizes = [2, 32], strides = [1, 1]} : vector<2x96xf32> to vector<2x32xf32>
    %97 = vector.extract_strided_slice %79 {offsets = [0, 64], sizes = [2, 32], strides = [1, 1]} : vector<2x96xf32> to vector<2x32xf32>
    %98 = vector.broadcast %14 : vector<1x32xf32> to vector<2x32xf32>
    %99 = arith.addf %97, %98 : vector<2x32xf32>
    %100 = arith.mulf %87, %99 : vector<2x32xf32>
    %101 = arith.addf %96, %100 : vector<2x32xf32>
    %102 = math.tanh %101 : vector<2x32xf32>
    %cst_27 = arith.constant 1.000000e+00 : f32
    %103 = vector.broadcast %cst_27 : f32 to vector<2x32xf32>
    %104 = arith.subf %103, %95 : vector<2x32xf32>
    %105 = arith.mulf %104, %102 : vector<2x32xf32>
    %106 = arith.mulf %95, %76 : vector<2x32xf32>
    %107 = arith.addf %105, %106 : vector<2x32xf32>
    %c4 = arith.constant 4 : index
    %c0_28 = arith.constant 0 : index
    %108 = vector.load %arg12[%c4, %c0_28] : memref<16x32xf32, #tpu.memory_space<vmem>>, vector<2x32xf32>
    tpu.vector_store %arg12[%c4, %c0_28], %107 {strides = array<i32>} : memref<16x32xf32, #tpu.memory_space<vmem>>, vector<2x32xf32>,
    %109 = vector.extract_strided_slice %12 {offsets = [6, 0], sizes = [2, 96], strides = [1, 1]} : vector<16x96xf32> to vector<2x96xf32>
    %cst_29 = arith.constant dense<0.000000e+00> : vector<2x96xf32>
    %110 = tpu.matmul %107, %13, %cst_29 {dimension_numbers = #tpu.dot_dimension_numbers<[1], [0], [0], [1], [0, 0, 1, 1], [], []>} : vector<2x32xf32>, vector<32x96xf32>, vector<2x96xf32> -> vector<2x96xf32>
    %111 = vector.extract_strided_slice %109 {offsets = [0, 0], sizes = [2, 32], strides = [1, 1]} : vector<2x96xf32> to vector<2x32xf32>
    %112 = vector.extract_strided_slice %110 {offsets = [0, 0], sizes = [2, 32], strides = [1, 1]} : vector<2x96xf32> to vector<2x32xf32>
    %113 = arith.addf %111, %112 : vector<2x32xf32>
    %114 = arith.negf %113 : vector<2x32xf32>
    %115 = math.exp %114 : vector<2x32xf32>
    %cst_30 = arith.constant 1.000000e+00 : f32
    %116 = vector.broadcast %cst_30 : f32 to vector<2x32xf32>
    %117 = arith.addf %116, %115 : vector<2x32xf32>
    %118 = arith.divf %116, %117 : vector<2x32xf32>
    %119 = vector.extract_strided_slice %109 {offsets = [0, 32], sizes = [2, 32], strides = [1, 1]} : vector<2x96xf32> to vector<2x32xf32>
    %120 = vector.extract_strided_slice %110 {offsets = [0, 32], sizes = [2, 32], strides = [1, 1]} : vector<2x96xf32> to vector<2x32xf32>
    %121 = arith.addf %119, %120 : vector<2x32xf32>
    %122 = arith.negf %121 : vector<2x32xf32>
    %123 = math.exp %122 : vector<2x32xf32>
    %cst_31 = arith.constant 1.000000e+00 : f32
    %124 = vector.broadcast %cst_31 : f32 to vector<2x32xf32>
    %125 = arith.addf %124, %123 : vector<2x32xf32>
    %126 = arith.divf %124, %125 : vector<2x32xf32>
    %127 = vector.extract_strided_slice %109 {offsets = [0, 64], sizes = [2, 32], strides = [1, 1]} : vector<2x96xf32> to vector<2x32xf32>
    %128 = vector.extract_strided_slice %110 {offsets = [0, 64], sizes = [2, 32], strides = [1, 1]} : vector<2x96xf32> to vector<2x32xf32>
    %129 = vector.broadcast %14 : vector<1x32xf32> to vector<2x32xf32>
    %130 = arith.addf %128, %129 : vector<2x32xf32>
    %131 = arith.mulf %118, %130 : vector<2x32xf32>
    %132 = arith.addf %127, %131 : vector<2x32xf32>
    %133 = math.tanh %132 : vector<2x32xf32>
    %cst_32 = arith.constant 1.000000e+00 : f32
    %134 = vector.broadcast %cst_32 : f32 to vector<2x32xf32>
    %135 = arith.subf %134, %126 : vector<2x32xf32>
    %136 = arith.mulf %135, %133 : vector<2x32xf32>
    %137 = arith.mulf %126, %107 : vector<2x32xf32>
    %138 = arith.addf %136, %137 : vector<2x32xf32>
    %c6 = arith.constant 6 : index
    %c0_33 = arith.constant 0 : index
    %139 = vector.load %arg12[%c6, %c0_33] : memref<16x32xf32, #tpu.memory_space<vmem>>, vector<2x32xf32>
    tpu.vector_store %arg12[%c6, %c0_33], %138 {strides = array<i32>} : memref<16x32xf32, #tpu.memory_space<vmem>>, vector<2x32xf32>,
    %140 = vector.extract_strided_slice %12 {offsets = [8, 0], sizes = [2, 96], strides = [1, 1]} : vector<16x96xf32> to vector<2x96xf32>
    %cst_34 = arith.constant dense<0.000000e+00> : vector<2x96xf32>
    %141 = tpu.matmul %138, %13, %cst_34 {dimension_numbers = #tpu.dot_dimension_numbers<[1], [0], [0], [1], [0, 0, 1, 1], [], []>} : vector<2x32xf32>, vector<32x96xf32>, vector<2x96xf32> -> vector<2x96xf32>
    %142 = vector.extract_strided_slice %140 {offsets = [0, 0], sizes = [2, 32], strides = [1, 1]} : vector<2x96xf32> to vector<2x32xf32>
    %143 = vector.extract_strided_slice %141 {offsets = [0, 0], sizes = [2, 32], strides = [1, 1]} : vector<2x96xf32> to vector<2x32xf32>
    %144 = arith.addf %142, %143 : vector<2x32xf32>
    %145 = arith.negf %144 : vector<2x32xf32>
    %146 = math.exp %145 : vector<2x32xf32>
    %cst_35 = arith.constant 1.000000e+00 : f32
    %147 = vector.broadcast %cst_35 : f32 to vector<2x32xf32>
    %148 = arith.addf %147, %146 : vector<2x32xf32>
    %149 = arith.divf %147, %148 : vector<2x32xf32>
    %150 = vector.extract_strided_slice %140 {offsets = [0, 32], sizes = [2, 32], strides = [1, 1]} : vector<2x96xf32> to vector<2x32xf32>
    %151 = vector.extract_strided_slice %141 {offsets = [0, 32], sizes = [2, 32], strides = [1, 1]} : vector<2x96xf32> to vector<2x32xf32>
    %152 = arith.addf %150, %151 : vector<2x32xf32>
    %153 = arith.negf %152 : vector<2x32xf32>
    %154 = math.exp %153 : vector<2x32xf32>
    %cst_36 = arith.constant 1.000000e+00 : f32
    %155 = vector.broadcast %cst_36 : f32 to vector<2x32xf32>
    %156 = arith.addf %155, %154 : vector<2x32xf32>
    %157 = arith.divf %155, %156 : vector<2x32xf32>
    %158 = vector.extract_strided_slice %140 {offsets = [0, 64], sizes = [2, 32], strides = [1, 1]} : vector<2x96xf32> to vector<2x32xf32>
    %159 = vector.extract_strided_slice %141 {offsets = [0, 64], sizes = [2, 32], strides = [1, 1]} : vector<2x96xf32> to vector<2x32xf32>
    %160 = vector.broadcast %14 : vector<1x32xf32> to vector<2x32xf32>
    %161 = arith.addf %159, %160 : vector<2x32xf32>
    %162 = arith.mulf %149, %161 : vector<2x32xf32>
    %163 = arith.addf %158, %162 : vector<2x32xf32>
    %164 = math.tanh %163 : vector<2x32xf32>
    %cst_37 = arith.constant 1.000000e+00 : f32
    %165 = vector.broadcast %cst_37 : f32 to vector<2x32xf32>
    %166 = arith.subf %165, %157 : vector<2x32xf32>
    %167 = arith.mulf %166, %164 : vector<2x32xf32>
    %168 = arith.mulf %157, %138 : vector<2x32xf32>
    %169 = arith.addf %167, %168 : vector<2x32xf32>
    %c8 = arith.constant 8 : index
    %c0_38 = arith.constant 0 : index
    %170 = vector.load %arg12[%c8, %c0_38] : memref<16x32xf32, #tpu.memory_space<vmem>>, vector<2x32xf32>
    tpu.vector_store %arg12[%c8, %c0_38], %169 {strides = array<i32>} : memref<16x32xf32, #tpu.memory_space<vmem>>, vector<2x32xf32>,
    %171 = vector.extract_strided_slice %12 {offsets = [10, 0], sizes = [2, 96], strides = [1, 1]} : vector<16x96xf32> to vector<2x96xf32>
    %cst_39 = arith.constant dense<0.000000e+00> : vector<2x96xf32>
    %172 = tpu.matmul %169, %13, %cst_39 {dimension_numbers = #tpu.dot_dimension_numbers<[1], [0], [0], [1], [0, 0, 1, 1], [], []>} : vector<2x32xf32>, vector<32x96xf32>, vector<2x96xf32> -> vector<2x96xf32>
    %173 = vector.extract_strided_slice %171 {offsets = [0, 0], sizes = [2, 32], strides = [1, 1]} : vector<2x96xf32> to vector<2x32xf32>
    %174 = vector.extract_strided_slice %172 {offsets = [0, 0], sizes = [2, 32], strides = [1, 1]} : vector<2x96xf32> to vector<2x32xf32>
    %175 = arith.addf %173, %174 : vector<2x32xf32>
    %176 = arith.negf %175 : vector<2x32xf32>
    %177 = math.exp %176 : vector<2x32xf32>
    %cst_40 = arith.constant 1.000000e+00 : f32
    %178 = vector.broadcast %cst_40 : f32 to vector<2x32xf32>
    %179 = arith.addf %178, %177 : vector<2x32xf32>
    %180 = arith.divf %178, %179 : vector<2x32xf32>
    %181 = vector.extract_strided_slice %171 {offsets = [0, 32], sizes = [2, 32], strides = [1, 1]} : vector<2x96xf32> to vector<2x32xf32>
    %182 = vector.extract_strided_slice %172 {offsets = [0, 32], sizes = [2, 32], strides = [1, 1]} : vector<2x96xf32> to vector<2x32xf32>
    %183 = arith.addf %181, %182 : vector<2x32xf32>
    %184 = arith.negf %183 : vector<2x32xf32>
    %185 = math.exp %184 : vector<2x32xf32>
    %cst_41 = arith.constant 1.000000e+00 : f32
    %186 = vector.broadcast %cst_41 : f32 to vector<2x32xf32>
    %187 = arith.addf %186, %185 : vector<2x32xf32>
    %188 = arith.divf %186, %187 : vector<2x32xf32>
    %189 = vector.extract_strided_slice %171 {offsets = [0, 64], sizes = [2, 32], strides = [1, 1]} : vector<2x96xf32> to vector<2x32xf32>
    %190 = vector.extract_strided_slice %172 {offsets = [0, 64], sizes = [2, 32], strides = [1, 1]} : vector<2x96xf32> to vector<2x32xf32>
    %191 = vector.broadcast %14 : vector<1x32xf32> to vector<2x32xf32>
    %192 = arith.addf %190, %191 : vector<2x32xf32>
    %193 = arith.mulf %180, %192 : vector<2x32xf32>
    %194 = arith.addf %189, %193 : vector<2x32xf32>
    %195 = math.tanh %194 : vector<2x32xf32>
    %cst_42 = arith.constant 1.000000e+00 : f32
    %196 = vector.broadcast %cst_42 : f32 to vector<2x32xf32>
    %197 = arith.subf %196, %188 : vector<2x32xf32>
    %198 = arith.mulf %197, %195 : vector<2x32xf32>
    %199 = arith.mulf %188, %169 : vector<2x32xf32>
    %200 = arith.addf %198, %199 : vector<2x32xf32>
    %c10 = arith.constant 10 : index
    %c0_43 = arith.constant 0 : index
    %201 = vector.load %arg12[%c10, %c0_43] : memref<16x32xf32, #tpu.memory_space<vmem>>, vector<2x32xf32>
    tpu.vector_store %arg12[%c10, %c0_43], %200 {strides = array<i32>} : memref<16x32xf32, #tpu.memory_space<vmem>>, vector<2x32xf32>,
    %202 = vector.extract_strided_slice %12 {offsets = [12, 0], sizes = [2, 96], strides = [1, 1]} : vector<16x96xf32> to vector<2x96xf32>
    %cst_44 = arith.constant dense<0.000000e+00> : vector<2x96xf32>
    %203 = tpu.matmul %200, %13, %cst_44 {dimension_numbers = #tpu.dot_dimension_numbers<[1], [0], [0], [1], [0, 0, 1, 1], [], []>} : vector<2x32xf32>, vector<32x96xf32>, vector<2x96xf32> -> vector<2x96xf32>
    %204 = vector.extract_strided_slice %202 {offsets = [0, 0], sizes = [2, 32], strides = [1, 1]} : vector<2x96xf32> to vector<2x32xf32>
    %205 = vector.extract_strided_slice %203 {offsets = [0, 0], sizes = [2, 32], strides = [1, 1]} : vector<2x96xf32> to vector<2x32xf32>
    %206 = arith.addf %204, %205 : vector<2x32xf32>
    %207 = arith.negf %206 : vector<2x32xf32>
    %208 = math.exp %207 : vector<2x32xf32>
    %cst_45 = arith.constant 1.000000e+00 : f32
    %209 = vector.broadcast %cst_45 : f32 to vector<2x32xf32>
    %210 = arith.addf %209, %208 : vector<2x32xf32>
    %211 = arith.divf %209, %210 : vector<2x32xf32>
    %212 = vector.extract_strided_slice %202 {offsets = [0, 32], sizes = [2, 32], strides = [1, 1]} : vector<2x96xf32> to vector<2x32xf32>
    %213 = vector.extract_strided_slice %203 {offsets = [0, 32], sizes = [2, 32], strides = [1, 1]} : vector<2x96xf32> to vector<2x32xf32>
    %214 = arith.addf %212, %213 : vector<2x32xf32>
    %215 = arith.negf %214 : vector<2x32xf32>
    %216 = math.exp %215 : vector<2x32xf32>
    %cst_46 = arith.constant 1.000000e+00 : f32
    %217 = vector.broadcast %cst_46 : f32 to vector<2x32xf32>
    %218 = arith.addf %217, %216 : vector<2x32xf32>
    %219 = arith.divf %217, %218 : vector<2x32xf32>
    %220 = vector.extract_strided_slice %202 {offsets = [0, 64], sizes = [2, 32], strides = [1, 1]} : vector<2x96xf32> to vector<2x32xf32>
    %221 = vector.extract_strided_slice %203 {offsets = [0, 64], sizes = [2, 32], strides = [1, 1]} : vector<2x96xf32> to vector<2x32xf32>
    %222 = vector.broadcast %14 : vector<1x32xf32> to vector<2x32xf32>
    %223 = arith.addf %221, %222 : vector<2x32xf32>
    %224 = arith.mulf %211, %223 : vector<2x32xf32>
    %225 = arith.addf %220, %224 : vector<2x32xf32>
    %226 = math.tanh %225 : vector<2x32xf32>
    %cst_47 = arith.constant 1.000000e+00 : f32
    %227 = vector.broadcast %cst_47 : f32 to vector<2x32xf32>
    %228 = arith.subf %227, %219 : vector<2x32xf32>
    %229 = arith.mulf %228, %226 : vector<2x32xf32>
    %230 = arith.mulf %219, %200 : vector<2x32xf32>
    %231 = arith.addf %229, %230 : vector<2x32xf32>
    %c12 = arith.constant 12 : index
    %c0_48 = arith.constant 0 : index
    %232 = vector.load %arg12[%c12, %c0_48] : memref<16x32xf32, #tpu.memory_space<vmem>>, vector<2x32xf32>
    tpu.vector_store %arg12[%c12, %c0_48], %231 {strides = array<i32>} : memref<16x32xf32, #tpu.memory_space<vmem>>, vector<2x32xf32>,
    %233 = vector.extract_strided_slice %12 {offsets = [14, 0], sizes = [2, 96], strides = [1, 1]} : vector<16x96xf32> to vector<2x96xf32>
    %cst_49 = arith.constant dense<0.000000e+00> : vector<2x96xf32>
    %234 = tpu.matmul %231, %13, %cst_49 {dimension_numbers = #tpu.dot_dimension_numbers<[1], [0], [0], [1], [0, 0, 1, 1], [], []>} : vector<2x32xf32>, vector<32x96xf32>, vector<2x96xf32> -> vector<2x96xf32>
    %235 = vector.extract_strided_slice %233 {offsets = [0, 0], sizes = [2, 32], strides = [1, 1]} : vector<2x96xf32> to vector<2x32xf32>
    %236 = vector.extract_strided_slice %234 {offsets = [0, 0], sizes = [2, 32], strides = [1, 1]} : vector<2x96xf32> to vector<2x32xf32>
    %237 = arith.addf %235, %236 : vector<2x32xf32>
    %238 = arith.negf %237 : vector<2x32xf32>
    %239 = math.exp %238 : vector<2x32xf32>
    %cst_50 = arith.constant 1.000000e+00 : f32
    %240 = vector.broadcast %cst_50 : f32 to vector<2x32xf32>
    %241 = arith.addf %240, %239 : vector<2x32xf32>
    %242 = arith.divf %240, %241 : vector<2x32xf32>
    %243 = vector.extract_strided_slice %233 {offsets = [0, 32], sizes = [2, 32], strides = [1, 1]} : vector<2x96xf32> to vector<2x32xf32>
    %244 = vector.extract_strided_slice %234 {offsets = [0, 32], sizes = [2, 32], strides = [1, 1]} : vector<2x96xf32> to vector<2x32xf32>
    %245 = arith.addf %243, %244 : vector<2x32xf32>
    %246 = arith.negf %245 : vector<2x32xf32>
    %247 = math.exp %246 : vector<2x32xf32>
    %cst_51 = arith.constant 1.000000e+00 : f32
    %248 = vector.broadcast %cst_51 : f32 to vector<2x32xf32>
    %249 = arith.addf %248, %247 : vector<2x32xf32>
    %250 = arith.divf %248, %249 : vector<2x32xf32>
    %251 = vector.extract_strided_slice %233 {offsets = [0, 64], sizes = [2, 32], strides = [1, 1]} : vector<2x96xf32> to vector<2x32xf32>
    %252 = vector.extract_strided_slice %234 {offsets = [0, 64], sizes = [2, 32], strides = [1, 1]} : vector<2x96xf32> to vector<2x32xf32>
    %253 = vector.broadcast %14 : vector<1x32xf32> to vector<2x32xf32>
    %254 = arith.addf %252, %253 : vector<2x32xf32>
    %255 = arith.mulf %242, %254 : vector<2x32xf32>
    %256 = arith.addf %251, %255 : vector<2x32xf32>
    %257 = math.tanh %256 : vector<2x32xf32>
    %cst_52 = arith.constant 1.000000e+00 : f32
    %258 = vector.broadcast %cst_52 : f32 to vector<2x32xf32>
    %259 = arith.subf %258, %250 : vector<2x32xf32>
    %260 = arith.mulf %259, %257 : vector<2x32xf32>
    %261 = arith.mulf %250, %231 : vector<2x32xf32>
    %262 = arith.addf %260, %261 : vector<2x32xf32>
    %c14 = arith.constant 14 : index
    %c0_53 = arith.constant 0 : index
    %263 = vector.load %arg12[%c14, %c0_53] : memref<16x32xf32, #tpu.memory_space<vmem>>, vector<2x32xf32>
    tpu.vector_store %arg12[%c14, %c0_53], %262 {strides = array<i32>} : memref<16x32xf32, #tpu.memory_space<vmem>>, vector<2x32xf32>,
    %c0_54 = arith.constant 0 : index
    %c0_55 = arith.constant 0 : index
    %264 = vector.load %arg12[%c0_54, %c0_55] : memref<16x32xf32, #tpu.memory_space<vmem>>, vector<16x32xf32>
    %c0_56 = arith.constant 0 : index
    %c0_57 = arith.constant 0 : index
    %265 = vector.load %arg6[%c0_56, %c0_57] : memref<32x96xf32, #tpu.memory_space<vmem>>, vector<32x96xf32>
    %cst_58 = arith.constant dense<0.000000e+00> : vector<16x96xf32>
    %266 = tpu.matmul %264, %265, %cst_58 {dimension_numbers = #tpu.dot_dimension_numbers<[1], [0], [0], [1], [0, 0, 1, 1], [], []>} : vector<16x32xf32>, vector<32x96xf32>, vector<16x96xf32> -> vector<16x96xf32>
    %c0_59 = arith.constant 0 : index
    %c0_60 = arith.constant 0 : index
    %267 = vector.load %arg8[%c0_59, %c0_60] : memref<1x96xf32, #tpu.memory_space<vmem>>, vector<1x96xf32>
    %268 = vector.broadcast %267 : vector<1x96xf32> to vector<16x96xf32>
    %269 = arith.addf %266, %268 : vector<16x96xf32>
    %c0_61 = arith.constant 0 : index
    %c0_62 = arith.constant 0 : index
    %270 = vector.load %arg7[%c0_61, %c0_62] : memref<32x96xf32, #tpu.memory_space<vmem>>, vector<32x96xf32>
    %c0_63 = arith.constant 0 : index
    %c0_64 = arith.constant 0 : index
    %271 = vector.load %arg9[%c0_63, %c0_64] : memref<1x32xf32, #tpu.memory_space<vmem>>, vector<1x32xf32>
    %cst_65 = arith.constant 0.000000e+00 : f32
    %272 = vector.broadcast %cst_65 : f32 to vector<2x32xf32>
    %273 = vector.extract_strided_slice %269 {offsets = [0, 0], sizes = [2, 96], strides = [1, 1]} : vector<16x96xf32> to vector<2x96xf32>
    %cst_66 = arith.constant dense<0.000000e+00> : vector<2x96xf32>
    %274 = tpu.matmul %272, %270, %cst_66 {dimension_numbers = #tpu.dot_dimension_numbers<[1], [0], [0], [1], [0, 0, 1, 1], [], []>} : vector<2x32xf32>, vector<32x96xf32>, vector<2x96xf32> -> vector<2x96xf32>
    %275 = vector.extract_strided_slice %273 {offsets = [0, 0], sizes = [2, 32], strides = [1, 1]} : vector<2x96xf32> to vector<2x32xf32>
    %276 = vector.extract_strided_slice %274 {offsets = [0, 0], sizes = [2, 32], strides = [1, 1]} : vector<2x96xf32> to vector<2x32xf32>
    %277 = arith.addf %275, %276 : vector<2x32xf32>
    %278 = arith.negf %277 : vector<2x32xf32>
    %279 = math.exp %278 : vector<2x32xf32>
    %cst_67 = arith.constant 1.000000e+00 : f32
    %280 = vector.broadcast %cst_67 : f32 to vector<2x32xf32>
    %281 = arith.addf %280, %279 : vector<2x32xf32>
    %282 = arith.divf %280, %281 : vector<2x32xf32>
    %283 = vector.extract_strided_slice %273 {offsets = [0, 32], sizes = [2, 32], strides = [1, 1]} : vector<2x96xf32> to vector<2x32xf32>
    %284 = vector.extract_strided_slice %274 {offsets = [0, 32], sizes = [2, 32], strides = [1, 1]} : vector<2x96xf32> to vector<2x32xf32>
    %285 = arith.addf %283, %284 : vector<2x32xf32>
    %286 = arith.negf %285 : vector<2x32xf32>
    %287 = math.exp %286 : vector<2x32xf32>
    %cst_68 = arith.constant 1.000000e+00 : f32
    %288 = vector.broadcast %cst_68 : f32 to vector<2x32xf32>
    %289 = arith.addf %288, %287 : vector<2x32xf32>
    %290 = arith.divf %288, %289 : vector<2x32xf32>
    %291 = vector.extract_strided_slice %273 {offsets = [0, 64], sizes = [2, 32], strides = [1, 1]} : vector<2x96xf32> to vector<2x32xf32>
    %292 = vector.extract_strided_slice %274 {offsets = [0, 64], sizes = [2, 32], strides = [1, 1]} : vector<2x96xf32> to vector<2x32xf32>
    %293 = vector.broadcast %271 : vector<1x32xf32> to vector<2x32xf32>
    %294 = arith.addf %292, %293 : vector<2x32xf32>
    %295 = arith.mulf %282, %294 : vector<2x32xf32>
    %296 = arith.addf %291, %295 : vector<2x32xf32>
    %297 = math.tanh %296 : vector<2x32xf32>
    %cst_69 = arith.constant 1.000000e+00 : f32
    %298 = vector.broadcast %cst_69 : f32 to vector<2x32xf32>
    %299 = arith.subf %298, %290 : vector<2x32xf32>
    %300 = arith.mulf %299, %297 : vector<2x32xf32>
    %301 = arith.mulf %290, %272 : vector<2x32xf32>
    %302 = arith.addf %300, %301 : vector<2x32xf32>
    %c0_70 = arith.constant 0 : index
    %c0_71 = arith.constant 0 : index
    %303 = vector.load %arg10[%c0_70, %c0_71] : memref<16x32xf32, #tpu.memory_space<vmem>>, vector<2x32xf32>
    tpu.vector_store %arg10[%c0_70, %c0_71], %302 {strides = array<i32>} : memref<16x32xf32, #tpu.memory_space<vmem>>, vector<2x32xf32>,
    %304 = vector.extract_strided_slice %269 {offsets = [2, 0], sizes = [2, 96], strides = [1, 1]} : vector<16x96xf32> to vector<2x96xf32>
    %cst_72 = arith.constant dense<0.000000e+00> : vector<2x96xf32>
    %305 = tpu.matmul %302, %270, %cst_72 {dimension_numbers = #tpu.dot_dimension_numbers<[1], [0], [0], [1], [0, 0, 1, 1], [], []>} : vector<2x32xf32>, vector<32x96xf32>, vector<2x96xf32> -> vector<2x96xf32>
    %306 = vector.extract_strided_slice %304 {offsets = [0, 0], sizes = [2, 32], strides = [1, 1]} : vector<2x96xf32> to vector<2x32xf32>
    %307 = vector.extract_strided_slice %305 {offsets = [0, 0], sizes = [2, 32], strides = [1, 1]} : vector<2x96xf32> to vector<2x32xf32>
    %308 = arith.addf %306, %307 : vector<2x32xf32>
    %309 = arith.negf %308 : vector<2x32xf32>
    %310 = math.exp %309 : vector<2x32xf32>
    %cst_73 = arith.constant 1.000000e+00 : f32
    %311 = vector.broadcast %cst_73 : f32 to vector<2x32xf32>
    %312 = arith.addf %311, %310 : vector<2x32xf32>
    %313 = arith.divf %311, %312 : vector<2x32xf32>
    %314 = vector.extract_strided_slice %304 {offsets = [0, 32], sizes = [2, 32], strides = [1, 1]} : vector<2x96xf32> to vector<2x32xf32>
    %315 = vector.extract_strided_slice %305 {offsets = [0, 32], sizes = [2, 32], strides = [1, 1]} : vector<2x96xf32> to vector<2x32xf32>
    %316 = arith.addf %314, %315 : vector<2x32xf32>
    %317 = arith.negf %316 : vector<2x32xf32>
    %318 = math.exp %317 : vector<2x32xf32>
    %cst_74 = arith.constant 1.000000e+00 : f32
    %319 = vector.broadcast %cst_74 : f32 to vector<2x32xf32>
    %320 = arith.addf %319, %318 : vector<2x32xf32>
    %321 = arith.divf %319, %320 : vector<2x32xf32>
    %322 = vector.extract_strided_slice %304 {offsets = [0, 64], sizes = [2, 32], strides = [1, 1]} : vector<2x96xf32> to vector<2x32xf32>
    %323 = vector.extract_strided_slice %305 {offsets = [0, 64], sizes = [2, 32], strides = [1, 1]} : vector<2x96xf32> to vector<2x32xf32>
    %324 = vector.broadcast %271 : vector<1x32xf32> to vector<2x32xf32>
    %325 = arith.addf %323, %324 : vector<2x32xf32>
    %326 = arith.mulf %313, %325 : vector<2x32xf32>
    %327 = arith.addf %322, %326 : vector<2x32xf32>
    %328 = math.tanh %327 : vector<2x32xf32>
    %cst_75 = arith.constant 1.000000e+00 : f32
    %329 = vector.broadcast %cst_75 : f32 to vector<2x32xf32>
    %330 = arith.subf %329, %321 : vector<2x32xf32>
    %331 = arith.mulf %330, %328 : vector<2x32xf32>
    %332 = arith.mulf %321, %302 : vector<2x32xf32>
    %333 = arith.addf %331, %332 : vector<2x32xf32>
    %c2_76 = arith.constant 2 : index
    %c0_77 = arith.constant 0 : index
    %334 = vector.load %arg10[%c2_76, %c0_77] : memref<16x32xf32, #tpu.memory_space<vmem>>, vector<2x32xf32>
    tpu.vector_store %arg10[%c2_76, %c0_77], %333 {strides = array<i32>} : memref<16x32xf32, #tpu.memory_space<vmem>>, vector<2x32xf32>,
    %335 = vector.extract_strided_slice %269 {offsets = [4, 0], sizes = [2, 96], strides = [1, 1]} : vector<16x96xf32> to vector<2x96xf32>
    %cst_78 = arith.constant dense<0.000000e+00> : vector<2x96xf32>
    %336 = tpu.matmul %333, %270, %cst_78 {dimension_numbers = #tpu.dot_dimension_numbers<[1], [0], [0], [1], [0, 0, 1, 1], [], []>} : vector<2x32xf32>, vector<32x96xf32>, vector<2x96xf32> -> vector<2x96xf32>
    %337 = vector.extract_strided_slice %335 {offsets = [0, 0], sizes = [2, 32], strides = [1, 1]} : vector<2x96xf32> to vector<2x32xf32>
    %338 = vector.extract_strided_slice %336 {offsets = [0, 0], sizes = [2, 32], strides = [1, 1]} : vector<2x96xf32> to vector<2x32xf32>
    %339 = arith.addf %337, %338 : vector<2x32xf32>
    %340 = arith.negf %339 : vector<2x32xf32>
    %341 = math.exp %340 : vector<2x32xf32>
    %cst_79 = arith.constant 1.000000e+00 : f32
    %342 = vector.broadcast %cst_79 : f32 to vector<2x32xf32>
    %343 = arith.addf %342, %341 : vector<2x32xf32>
    %344 = arith.divf %342, %343 : vector<2x32xf32>
    %345 = vector.extract_strided_slice %335 {offsets = [0, 32], sizes = [2, 32], strides = [1, 1]} : vector<2x96xf32> to vector<2x32xf32>
    %346 = vector.extract_strided_slice %336 {offsets = [0, 32], sizes = [2, 32], strides = [1, 1]} : vector<2x96xf32> to vector<2x32xf32>
    %347 = arith.addf %345, %346 : vector<2x32xf32>
    %348 = arith.negf %347 : vector<2x32xf32>
    %349 = math.exp %348 : vector<2x32xf32>
    %cst_80 = arith.constant 1.000000e+00 : f32
    %350 = vector.broadcast %cst_80 : f32 to vector<2x32xf32>
    %351 = arith.addf %350, %349 : vector<2x32xf32>
    %352 = arith.divf %350, %351 : vector<2x32xf32>
    %353 = vector.extract_strided_slice %335 {offsets = [0, 64], sizes = [2, 32], strides = [1, 1]} : vector<2x96xf32> to vector<2x32xf32>
    %354 = vector.extract_strided_slice %336 {offsets = [0, 64], sizes = [2, 32], strides = [1, 1]} : vector<2x96xf32> to vector<2x32xf32>
    %355 = vector.broadcast %271 : vector<1x32xf32> to vector<2x32xf32>
    %356 = arith.addf %354, %355 : vector<2x32xf32>
    %357 = arith.mulf %344, %356 : vector<2x32xf32>
    %358 = arith.addf %353, %357 : vector<2x32xf32>
    %359 = math.tanh %358 : vector<2x32xf32>
    %cst_81 = arith.constant 1.000000e+00 : f32
    %360 = vector.broadcast %cst_81 : f32 to vector<2x32xf32>
    %361 = arith.subf %360, %352 : vector<2x32xf32>
    %362 = arith.mulf %361, %359 : vector<2x32xf32>
    %363 = arith.mulf %352, %333 : vector<2x32xf32>
    %364 = arith.addf %362, %363 : vector<2x32xf32>
    %c4_82 = arith.constant 4 : index
    %c0_83 = arith.constant 0 : index
    %365 = vector.load %arg10[%c4_82, %c0_83] : memref<16x32xf32, #tpu.memory_space<vmem>>, vector<2x32xf32>
    tpu.vector_store %arg10[%c4_82, %c0_83], %364 {strides = array<i32>} : memref<16x32xf32, #tpu.memory_space<vmem>>, vector<2x32xf32>,
    %366 = vector.extract_strided_slice %269 {offsets = [6, 0], sizes = [2, 96], strides = [1, 1]} : vector<16x96xf32> to vector<2x96xf32>
    %cst_84 = arith.constant dense<0.000000e+00> : vector<2x96xf32>
    %367 = tpu.matmul %364, %270, %cst_84 {dimension_numbers = #tpu.dot_dimension_numbers<[1], [0], [0], [1], [0, 0, 1, 1], [], []>} : vector<2x32xf32>, vector<32x96xf32>, vector<2x96xf32> -> vector<2x96xf32>
    %368 = vector.extract_strided_slice %366 {offsets = [0, 0], sizes = [2, 32], strides = [1, 1]} : vector<2x96xf32> to vector<2x32xf32>
    %369 = vector.extract_strided_slice %367 {offsets = [0, 0], sizes = [2, 32], strides = [1, 1]} : vector<2x96xf32> to vector<2x32xf32>
    %370 = arith.addf %368, %369 : vector<2x32xf32>
    %371 = arith.negf %370 : vector<2x32xf32>
    %372 = math.exp %371 : vector<2x32xf32>
    %cst_85 = arith.constant 1.000000e+00 : f32
    %373 = vector.broadcast %cst_85 : f32 to vector<2x32xf32>
    %374 = arith.addf %373, %372 : vector<2x32xf32>
    %375 = arith.divf %373, %374 : vector<2x32xf32>
    %376 = vector.extract_strided_slice %366 {offsets = [0, 32], sizes = [2, 32], strides = [1, 1]} : vector<2x96xf32> to vector<2x32xf32>
    %377 = vector.extract_strided_slice %367 {offsets = [0, 32], sizes = [2, 32], strides = [1, 1]} : vector<2x96xf32> to vector<2x32xf32>
    %378 = arith.addf %376, %377 : vector<2x32xf32>
    %379 = arith.negf %378 : vector<2x32xf32>
    %380 = math.exp %379 : vector<2x32xf32>
    %cst_86 = arith.constant 1.000000e+00 : f32
    %381 = vector.broadcast %cst_86 : f32 to vector<2x32xf32>
    %382 = arith.addf %381, %380 : vector<2x32xf32>
    %383 = arith.divf %381, %382 : vector<2x32xf32>
    %384 = vector.extract_strided_slice %366 {offsets = [0, 64], sizes = [2, 32], strides = [1, 1]} : vector<2x96xf32> to vector<2x32xf32>
    %385 = vector.extract_strided_slice %367 {offsets = [0, 64], sizes = [2, 32], strides = [1, 1]} : vector<2x96xf32> to vector<2x32xf32>
    %386 = vector.broadcast %271 : vector<1x32xf32> to vector<2x32xf32>
    %387 = arith.addf %385, %386 : vector<2x32xf32>
    %388 = arith.mulf %375, %387 : vector<2x32xf32>
    %389 = arith.addf %384, %388 : vector<2x32xf32>
    %390 = math.tanh %389 : vector<2x32xf32>
    %cst_87 = arith.constant 1.000000e+00 : f32
    %391 = vector.broadcast %cst_87 : f32 to vector<2x32xf32>
    %392 = arith.subf %391, %383 : vector<2x32xf32>
    %393 = arith.mulf %392, %390 : vector<2x32xf32>
    %394 = arith.mulf %383, %364 : vector<2x32xf32>
    %395 = arith.addf %393, %394 : vector<2x32xf32>
    %c6_88 = arith.constant 6 : index
    %c0_89 = arith.constant 0 : index
    %396 = vector.load %arg10[%c6_88, %c0_89] : memref<16x32xf32, #tpu.memory_space<vmem>>, vector<2x32xf32>
    tpu.vector_store %arg10[%c6_88, %c0_89], %395 {strides = array<i32>} : memref<16x32xf32, #tpu.memory_space<vmem>>, vector<2x32xf32>,
    %397 = vector.extract_strided_slice %269 {offsets = [8, 0], sizes = [2, 96], strides = [1, 1]} : vector<16x96xf32> to vector<2x96xf32>
    %cst_90 = arith.constant dense<0.000000e+00> : vector<2x96xf32>
    %398 = tpu.matmul %395, %270, %cst_90 {dimension_numbers = #tpu.dot_dimension_numbers<[1], [0], [0], [1], [0, 0, 1, 1], [], []>} : vector<2x32xf32>, vector<32x96xf32>, vector<2x96xf32> -> vector<2x96xf32>
    %399 = vector.extract_strided_slice %397 {offsets = [0, 0], sizes = [2, 32], strides = [1, 1]} : vector<2x96xf32> to vector<2x32xf32>
    %400 = vector.extract_strided_slice %398 {offsets = [0, 0], sizes = [2, 32], strides = [1, 1]} : vector<2x96xf32> to vector<2x32xf32>
    %401 = arith.addf %399, %400 : vector<2x32xf32>
    %402 = arith.negf %401 : vector<2x32xf32>
    %403 = math.exp %402 : vector<2x32xf32>
    %cst_91 = arith.constant 1.000000e+00 : f32
    %404 = vector.broadcast %cst_91 : f32 to vector<2x32xf32>
    %405 = arith.addf %404, %403 : vector<2x32xf32>
    %406 = arith.divf %404, %405 : vector<2x32xf32>
    %407 = vector.extract_strided_slice %397 {offsets = [0, 32], sizes = [2, 32], strides = [1, 1]} : vector<2x96xf32> to vector<2x32xf32>
    %408 = vector.extract_strided_slice %398 {offsets = [0, 32], sizes = [2, 32], strides = [1, 1]} : vector<2x96xf32> to vector<2x32xf32>
    %409 = arith.addf %407, %408 : vector<2x32xf32>
    %410 = arith.negf %409 : vector<2x32xf32>
    %411 = math.exp %410 : vector<2x32xf32>
    %cst_92 = arith.constant 1.000000e+00 : f32
    %412 = vector.broadcast %cst_92 : f32 to vector<2x32xf32>
    %413 = arith.addf %412, %411 : vector<2x32xf32>
    %414 = arith.divf %412, %413 : vector<2x32xf32>
    %415 = vector.extract_strided_slice %397 {offsets = [0, 64], sizes = [2, 32], strides = [1, 1]} : vector<2x96xf32> to vector<2x32xf32>
    %416 = vector.extract_strided_slice %398 {offsets = [0, 64], sizes = [2, 32], strides = [1, 1]} : vector<2x96xf32> to vector<2x32xf32>
    %417 = vector.broadcast %271 : vector<1x32xf32> to vector<2x32xf32>
    %418 = arith.addf %416, %417 : vector<2x32xf32>
    %419 = arith.mulf %406, %418 : vector<2x32xf32>
    %420 = arith.addf %415, %419 : vector<2x32xf32>
    %421 = math.tanh %420 : vector<2x32xf32>
    %cst_93 = arith.constant 1.000000e+00 : f32
    %422 = vector.broadcast %cst_93 : f32 to vector<2x32xf32>
    %423 = arith.subf %422, %414 : vector<2x32xf32>
    %424 = arith.mulf %423, %421 : vector<2x32xf32>
    %425 = arith.mulf %414, %395 : vector<2x32xf32>
    %426 = arith.addf %424, %425 : vector<2x32xf32>
    %c8_94 = arith.constant 8 : index
    %c0_95 = arith.constant 0 : index
    %427 = vector.load %arg10[%c8_94, %c0_95] : memref<16x32xf32, #tpu.memory_space<vmem>>, vector<2x32xf32>
    tpu.vector_store %arg10[%c8_94, %c0_95], %426 {strides = array<i32>} : memref<16x32xf32, #tpu.memory_space<vmem>>, vector<2x32xf32>,
    %428 = vector.extract_strided_slice %269 {offsets = [10, 0], sizes = [2, 96], strides = [1, 1]} : vector<16x96xf32> to vector<2x96xf32>
    %cst_96 = arith.constant dense<0.000000e+00> : vector<2x96xf32>
    %429 = tpu.matmul %426, %270, %cst_96 {dimension_numbers = #tpu.dot_dimension_numbers<[1], [0], [0], [1], [0, 0, 1, 1], [], []>} : vector<2x32xf32>, vector<32x96xf32>, vector<2x96xf32> -> vector<2x96xf32>
    %430 = vector.extract_strided_slice %428 {offsets = [0, 0], sizes = [2, 32], strides = [1, 1]} : vector<2x96xf32> to vector<2x32xf32>
    %431 = vector.extract_strided_slice %429 {offsets = [0, 0], sizes = [2, 32], strides = [1, 1]} : vector<2x96xf32> to vector<2x32xf32>
    %432 = arith.addf %430, %431 : vector<2x32xf32>
    %433 = arith.negf %432 : vector<2x32xf32>
    %434 = math.exp %433 : vector<2x32xf32>
    %cst_97 = arith.constant 1.000000e+00 : f32
    %435 = vector.broadcast %cst_97 : f32 to vector<2x32xf32>
    %436 = arith.addf %435, %434 : vector<2x32xf32>
    %437 = arith.divf %435, %436 : vector<2x32xf32>
    %438 = vector.extract_strided_slice %428 {offsets = [0, 32], sizes = [2, 32], strides = [1, 1]} : vector<2x96xf32> to vector<2x32xf32>
    %439 = vector.extract_strided_slice %429 {offsets = [0, 32], sizes = [2, 32], strides = [1, 1]} : vector<2x96xf32> to vector<2x32xf32>
    %440 = arith.addf %438, %439 : vector<2x32xf32>
    %441 = arith.negf %440 : vector<2x32xf32>
    %442 = math.exp %441 : vector<2x32xf32>
    %cst_98 = arith.constant 1.000000e+00 : f32
    %443 = vector.broadcast %cst_98 : f32 to vector<2x32xf32>
    %444 = arith.addf %443, %442 : vector<2x32xf32>
    %445 = arith.divf %443, %444 : vector<2x32xf32>
    %446 = vector.extract_strided_slice %428 {offsets = [0, 64], sizes = [2, 32], strides = [1, 1]} : vector<2x96xf32> to vector<2x32xf32>
    %447 = vector.extract_strided_slice %429 {offsets = [0, 64], sizes = [2, 32], strides = [1, 1]} : vector<2x96xf32> to vector<2x32xf32>
    %448 = vector.broadcast %271 : vector<1x32xf32> to vector<2x32xf32>
    %449 = arith.addf %447, %448 : vector<2x32xf32>
    %450 = arith.mulf %437, %449 : vector<2x32xf32>
    %451 = arith.addf %446, %450 : vector<2x32xf32>
    %452 = math.tanh %451 : vector<2x32xf32>
    %cst_99 = arith.constant 1.000000e+00 : f32
    %453 = vector.broadcast %cst_99 : f32 to vector<2x32xf32>
    %454 = arith.subf %453, %445 : vector<2x32xf32>
    %455 = arith.mulf %454, %452 : vector<2x32xf32>
    %456 = arith.mulf %445, %426 : vector<2x32xf32>
    %457 = arith.addf %455, %456 : vector<2x32xf32>
    %c10_100 = arith.constant 10 : index
    %c0_101 = arith.constant 0 : index
    %458 = vector.load %arg10[%c10_100, %c0_101] : memref<16x32xf32, #tpu.memory_space<vmem>>, vector<2x32xf32>
    tpu.vector_store %arg10[%c10_100, %c0_101], %457 {strides = array<i32>} : memref<16x32xf32, #tpu.memory_space<vmem>>, vector<2x32xf32>,
    %459 = vector.extract_strided_slice %269 {offsets = [12, 0], sizes = [2, 96], strides = [1, 1]} : vector<16x96xf32> to vector<2x96xf32>
    %cst_102 = arith.constant dense<0.000000e+00> : vector<2x96xf32>
    %460 = tpu.matmul %457, %270, %cst_102 {dimension_numbers = #tpu.dot_dimension_numbers<[1], [0], [0], [1], [0, 0, 1, 1], [], []>} : vector<2x32xf32>, vector<32x96xf32>, vector<2x96xf32> -> vector<2x96xf32>
    %461 = vector.extract_strided_slice %459 {offsets = [0, 0], sizes = [2, 32], strides = [1, 1]} : vector<2x96xf32> to vector<2x32xf32>
    %462 = vector.extract_strided_slice %460 {offsets = [0, 0], sizes = [2, 32], strides = [1, 1]} : vector<2x96xf32> to vector<2x32xf32>
    %463 = arith.addf %461, %462 : vector<2x32xf32>
    %464 = arith.negf %463 : vector<2x32xf32>
    %465 = math.exp %464 : vector<2x32xf32>
    %cst_103 = arith.constant 1.000000e+00 : f32
    %466 = vector.broadcast %cst_103 : f32 to vector<2x32xf32>
    %467 = arith.addf %466, %465 : vector<2x32xf32>
    %468 = arith.divf %466, %467 : vector<2x32xf32>
    %469 = vector.extract_strided_slice %459 {offsets = [0, 32], sizes = [2, 32], strides = [1, 1]} : vector<2x96xf32> to vector<2x32xf32>
    %470 = vector.extract_strided_slice %460 {offsets = [0, 32], sizes = [2, 32], strides = [1, 1]} : vector<2x96xf32> to vector<2x32xf32>
    %471 = arith.addf %469, %470 : vector<2x32xf32>
    %472 = arith.negf %471 : vector<2x32xf32>
    %473 = math.exp %472 : vector<2x32xf32>
    %cst_104 = arith.constant 1.000000e+00 : f32
    %474 = vector.broadcast %cst_104 : f32 to vector<2x32xf32>
    %475 = arith.addf %474, %473 : vector<2x32xf32>
    %476 = arith.divf %474, %475 : vector<2x32xf32>
    %477 = vector.extract_strided_slice %459 {offsets = [0, 64], sizes = [2, 32], strides = [1, 1]} : vector<2x96xf32> to vector<2x32xf32>
    %478 = vector.extract_strided_slice %460 {offsets = [0, 64], sizes = [2, 32], strides = [1, 1]} : vector<2x96xf32> to vector<2x32xf32>
    %479 = vector.broadcast %271 : vector<1x32xf32> to vector<2x32xf32>
    %480 = arith.addf %478, %479 : vector<2x32xf32>
    %481 = arith.mulf %468, %480 : vector<2x32xf32>
    %482 = arith.addf %477, %481 : vector<2x32xf32>
    %483 = math.tanh %482 : vector<2x32xf32>
    %cst_105 = arith.constant 1.000000e+00 : f32
    %484 = vector.broadcast %cst_105 : f32 to vector<2x32xf32>
    %485 = arith.subf %484, %476 : vector<2x32xf32>
    %486 = arith.mulf %485, %483 : vector<2x32xf32>
    %487 = arith.mulf %476, %457 : vector<2x32xf32>
    %488 = arith.addf %486, %487 : vector<2x32xf32>
    %c12_106 = arith.constant 12 : index
    %c0_107 = arith.constant 0 : index
    %489 = vector.load %arg10[%c12_106, %c0_107] : memref<16x32xf32, #tpu.memory_space<vmem>>, vector<2x32xf32>
    tpu.vector_store %arg10[%c12_106, %c0_107], %488 {strides = array<i32>} : memref<16x32xf32, #tpu.memory_space<vmem>>, vector<2x32xf32>,
    %490 = vector.extract_strided_slice %269 {offsets = [14, 0], sizes = [2, 96], strides = [1, 1]} : vector<16x96xf32> to vector<2x96xf32>
    %cst_108 = arith.constant dense<0.000000e+00> : vector<2x96xf32>
    %491 = tpu.matmul %488, %270, %cst_108 {dimension_numbers = #tpu.dot_dimension_numbers<[1], [0], [0], [1], [0, 0, 1, 1], [], []>} : vector<2x32xf32>, vector<32x96xf32>, vector<2x96xf32> -> vector<2x96xf32>
    %492 = vector.extract_strided_slice %490 {offsets = [0, 0], sizes = [2, 32], strides = [1, 1]} : vector<2x96xf32> to vector<2x32xf32>
    %493 = vector.extract_strided_slice %491 {offsets = [0, 0], sizes = [2, 32], strides = [1, 1]} : vector<2x96xf32> to vector<2x32xf32>
    %494 = arith.addf %492, %493 : vector<2x32xf32>
    %495 = arith.negf %494 : vector<2x32xf32>
    %496 = math.exp %495 : vector<2x32xf32>
    %cst_109 = arith.constant 1.000000e+00 : f32
    %497 = vector.broadcast %cst_109 : f32 to vector<2x32xf32>
    %498 = arith.addf %497, %496 : vector<2x32xf32>
    %499 = arith.divf %497, %498 : vector<2x32xf32>
    %500 = vector.extract_strided_slice %490 {offsets = [0, 32], sizes = [2, 32], strides = [1, 1]} : vector<2x96xf32> to vector<2x32xf32>
    %501 = vector.extract_strided_slice %491 {offsets = [0, 32], sizes = [2, 32], strides = [1, 1]} : vector<2x96xf32> to vector<2x32xf32>
    %502 = arith.addf %500, %501 : vector<2x32xf32>
    %503 = arith.negf %502 : vector<2x32xf32>
    %504 = math.exp %503 : vector<2x32xf32>
    %cst_110 = arith.constant 1.000000e+00 : f32
    %505 = vector.broadcast %cst_110 : f32 to vector<2x32xf32>
    %506 = arith.addf %505, %504 : vector<2x32xf32>
    %507 = arith.divf %505, %506 : vector<2x32xf32>
    %508 = vector.extract_strided_slice %490 {offsets = [0, 64], sizes = [2, 32], strides = [1, 1]} : vector<2x96xf32> to vector<2x32xf32>
    %509 = vector.extract_strided_slice %491 {offsets = [0, 64], sizes = [2, 32], strides = [1, 1]} : vector<2x96xf32> to vector<2x32xf32>
    %510 = vector.broadcast %271 : vector<1x32xf32> to vector<2x32xf32>
    %511 = arith.addf %509, %510 : vector<2x32xf32>
    %512 = arith.mulf %499, %511 : vector<2x32xf32>
    %513 = arith.addf %508, %512 : vector<2x32xf32>
    %514 = math.tanh %513 : vector<2x32xf32>
    %cst_111 = arith.constant 1.000000e+00 : f32
    %515 = vector.broadcast %cst_111 : f32 to vector<2x32xf32>
    %516 = arith.subf %515, %507 : vector<2x32xf32>
    %517 = arith.mulf %516, %514 : vector<2x32xf32>
    %518 = arith.mulf %507, %488 : vector<2x32xf32>
    %519 = arith.addf %517, %518 : vector<2x32xf32>
    %c14_112 = arith.constant 14 : index
    %c0_113 = arith.constant 0 : index
    %520 = vector.load %arg10[%c14_112, %c0_113] : memref<16x32xf32, #tpu.memory_space<vmem>>, vector<2x32xf32>
    tpu.vector_store %arg10[%c14_112, %c0_113], %519 {strides = array<i32>} : memref<16x32xf32, #tpu.memory_space<vmem>>, vector<2x32xf32>,
    %c0_114 = arith.constant 0 : index
    %c0_115 = arith.constant 0 : index
    %c0_116 = arith.constant 0 : index
    %521 = vector.load %arg11[%c0_114, %c0_115, %c0_116] : memref<2x2x32xf32, #tpu.memory_space<vmem>>, vector<1x2x32xf32>
    %522 = vector.shape_cast %521 : vector<1x2x32xf32> to vector<2x32xf32>
    %523 = vector.shape_cast %262 : vector<2x32xf32> to vector<1x2x32xf32>
    tpu.vector_store %arg11[%c0_114, %c0_115, %c0_116], %523 {strides = array<i32>} : memref<2x2x32xf32, #tpu.memory_space<vmem>>, vector<1x2x32xf32>,
    %c1 = arith.constant 1 : index
    %c0_117 = arith.constant 0 : index
    %c0_118 = arith.constant 0 : index
    %524 = vector.load %arg11[%c1, %c0_117, %c0_118] : memref<2x2x32xf32, #tpu.memory_space<vmem>>, vector<1x2x32xf32>
    %525 = vector.shape_cast %524 : vector<1x2x32xf32> to vector<2x32xf32>
    %526 = vector.shape_cast %519 : vector<2x32xf32> to vector<1x2x32xf32>
    tpu.vector_store %arg11[%c1, %c0_117, %c0_118], %526 {strides = array<i32>} : memref<2x2x32xf32, #tpu.memory_space<vmem>>, vector<1x2x32xf32>,
    return
  }
}

</mosaic_0001>

<bundles_post_ra>
// kernel: encoder_forward.1
= control target key start
LH: loop header
LB: loop body
LE: loop exit
PB: predicated region body
PF: predicated region fallthrough
CT: control target
= control target key end

     0   :  { %17 = vsyncpa [#allocation4], 0  ;;  %s3219_s0 = inlined_call_operand.vmem [shape: s32[16,1], index: 0, kind: input, shape index: {}]   ;;  %s3220_s1 = inlined_call_operand.vmem [shape: f32[20,16], index: 1, kind: input, shape index: {}]   ;;  %s3221_s2 = inlined_call_operand.hbm [shape: f32[16,96], index: 2, kind: input, shape index: {}]   ;;  %s3222_s3 = inlined_call_operand.vmem [shape: f32[32,96], index: 3, kind: input, shape index: {}]   ;;  %s3223_s4 = inlined_call_operand.vmem [shape: f32[1,96], index: 4, kind: input, shape index: {}]   ;;  %s3224_s5 = inlined_call_operand.vmem [shape: f32[1,32], index: 5, kind: input, shape index: {}]   ;;  %s3225_s6 = inlined_call_operand.vmem [shape: f32[32,96], index: 6, kind: input, shape index: {}]   ;;  %s3226_s7 = inlined_call_operand.vmem [shape: f32[32,96], index: 7, kind: input, shape index: {}]   ;;  %s3227_s8 = inlined_call_operand.vmem [shape: f32[1,96], index: 8, kind: input, shape index: {}]   ;;  %s3228_s9 = inlined_call_operand.vmem [shape: f32[1,32], index: 9, kind: input, shape index: {}]   ;;  %s3229_s10 = inlined_call_operand.vmem [shape: f32[16,32], index: 10, kind: output, shape index: {0}]   ;;  %s3230_s11 = inlined_call_operand.hbm [shape: f32[2,2,32], index: 11, kind: output, shape index: {1}]  }
   0x1   :  { %18 = vsyncpa [#allocation5], 0  ;;  %s2657_s17 = smov [#allocation3]  }
   0x2   :  { %s28_s18 = sshll.u32 %s2657_s17, 4  ;;  %s29_s18 = int_to_ptr.vmem [resolvable:$true] %s28_s18 }
   0x3   :  { %s2621_s19 = scalar_lea.vmem %s29_s18, 256  ;;  %p2626_p1 = scmp.lt.s32.totalorder %s29_s18, %s29_s18 }
   0x4   :  { %p2622_p0 = scmp.ne.s32.totalorder %s29_s18, %s2621_s19  ;;  %p2627_p2 = scmp.lt.s32.totalorder %s2621_s19, %s2621_s19 }
   0x6   :  { %p2628_p3 = por %p2627_p2, %p2626_p1 }
   0x8   :  { %p2629_p4 = pnand %p2628_p3, %p2622_p0 }
   0xa   :  { %2632 = shalt.err (!%p2629_p4)
}
   0xb   :  { %s2658_s20 = smov 128   ;;  %s2659_s21 = smov 8  }
   0xc   :  { %34 = dma.hbm_to_vmem [thread:$0]  %s3221_s2, 256, %s29_s18, [#allocation4], %s2658_s20, %s2658_s20, %s2659_s21  }
   0xd   :  { %2653 = dma.done.wait [#allocation4], 256  }
   0xe   :  { %2654 = vsyncadd [#allocation4], 4294967040  ;;  %v2660_v0 = vmov 0   ;;  %vm78_vm0 = vcmask 1043456   ;;  %v2661_v1 = vmov 0.0   ;;  %v52_v2 = vld [vmem:[%s3219_s0] sm:$0xff]  ;;  %v54_v12 = vlaneseq }
   0xf   :  { %2516 = vset.pattern.permute.xlu0 %v2660_v0  ;;  %2318 = vmatprep.subr.mxu1 %v2661_v1  ;;  %v70_v3 = vld [vmem:[%s3220_s1 + $0x10] sm:$0xf]  ;;  %v69_v4 = vld [vmem:[%s3220_s1 + $0x8] sm:$0xff]  ;;  %v68_v6 = vld [vmem:[%s3220_s1] sm:$0xff]  ;;  %vm2662_vm1 = vmmov 0   ;;  %vm71_vm2 = vcmask 162816  }
  0x10   :  { %57 = vperm.xlu0 %2516, %v52_v2   ;;  %2302 = vmatprep.subr.msk.mxu0 %vm78_vm0, %v70_v3  ;;  %v53_v5 = vld [vmem:[%s3219_s0 + $0x8] sm:$0xff]  ;;  %v2750_v7 = vld [vmem:[%s3222_s3 + $0x18] sm:$0xff]  ;;  %v2756_v8 = vld [vmem:[%s3222_s3 + $0x10] sm:$0xff]  ;;  %v55_v13 = vand.u32 127, %v54_v12  ;;  %s2663_s21 = smov 64   ;;  %vm166_vm5 = vcmask 130048  }
  0x11   :  { %2303 = vmatpush3.msk.msra.mxu0 %vm78_vm0, %v70_v3  ;;  %2319 = vmatpush3.msra.mxu1 %v2750_v7  ;;  %v158_v9 = vld [vmem:[#allocation3 + $0x8] sm:$0xff]  ;;  %v2762_v10 = vld [vmem:[%s3222_s3 + $0x8] sm:$0xff]  ;;  %v2771_v11 = vld [vmem:[%s3222_s3] sm:$0xff]  ;;  %vm366_vm6 = vcmask 254976   ;;  %vm253_vm7 = vcmask 261120   ;;  %vm477_vm8 = vcmask 257026  }
  0x12   :  { %2304 = vmatprep.subr.mxu0 %v69_v4  ;;  %2320 = vmatprep.subr.mxu1 %v2661_v1  ;;  %v157_v18 = vld [vmem:[#allocation3] sm:$0xff]  ;;  %v2173_v19 = vld [vmem:[%s3224_s5] ss:$0 sm:$0xff]  ;;  %vm705_vm9 = vcmask 261126   ;;  %vm591_vm10 = vcmask 259076   ;;  %s2665_s27 = smov [#allocation6]  }
  0x13   :  { %2305 = vmatpush3.msra.mxu0 %v69_v4  ;;  %2321 = vmatpush3.msra.mxu1 %v2756_v8  ;;  %v2169_v26 = vld [vmem:[%s3223_s4] ss:$0 sm:$0xff]  ;;  %s2664_s4 = smov 96   ;;  %s2150_s28 = sshll.u32 %s2665_s27, 4  ;;  %s2151_s28 = int_to_ptr.vmem [resolvable:$true] %s2150_s28 }
  0x14   :  { %60 = vperm.xlu0 %2516, %v53_v5   ;;  %2306 = vmatprep.subr.mxu0 %v68_v6  ;;  %p2638_p6 = scmp.lt.s32.totalorder %s2151_s28, %s2151_s28 }
  0x15   :  { %2307 = vmatpush3.msra.mxu0 %v68_v6  ;;  %2326 = vmatprep.mubr.msk.f32.mxu1 %vm2662_vm1, %v2661_v1 }
  0x16   :  { %2322 = vmatprep.subr.mxu1 %v2661_v1  ;;  %2311 = vmatprep.subr.mxu0 %v158_v9 }
  0x17   :  { %2323 = vmatpush3.msra.mxu1 %v2762_v10  ;;  %339 = vrot.lane.b32.xlu1 %v2173_v19, %s2663_s21 }
  0x18   :  { %2324 = vmatprep.subr.mxu1 %v2661_v1 }
  0x19   :  { %2325 = vmatpush3.msra.mxu1 %v2771_v11 }
  0x1a   :  { %2327 = vmatmul.mubr.f32.vlgmr.msra.gmra.mxu1 %v2661_v1  ;;  %2340 = vmatprep.subr.mxu1 %v2661_v1 }
  0x1b   :  { %2341 = vmatpush3.msra.mxu1 %v2750_v7  ;;  %2348 = vmatprep.mubr.msk.f32.mxu1 %vm2662_vm1, %v2661_v1 }
  0x1c   :  { %2342 = vmatprep.subr.mxu1 %v2661_v1 }
  0x1d   :  { %2343 = vmatpush3.msra.mxu1 %v2756_v8 }
  0x1e   :  { %2344 = vmatprep.subr.mxu1 %v2661_v1 }
  0x1f   :  { %2345 = vmatpush3.msra.mxu1 %v2762_v10 }
  0x20   :  { %2346 = vmatprep.subr.mxu1 %v2661_v1 }
  0x21   :  { %2347 = vmatpush3.msra.mxu1 %v2771_v11 }
  0x22   :  { %2362 = vmatprep.subr.mxu1 %v2661_v1 }
  0x89   :  { %v2795_v22 = vpop.permute.xlu1 %339 }
  0x8b   :  { %v58_v14 = vpop.permute.xlu0 %57 }
  0x8c   :  { %vm62_vm3 = vcmp.eq.s32.totalorder %v55_v13, %v58_v14 }
  0x8d   :  { %v2164_v15 = vsel %vm62_vm3, 1.0, %v2661_v1 }
  0x8e   :  { %2308 = vmatprep.mubr.msk.f32.mxu0 %vm71_vm2, %v2164_v15 }
  0x8f   :  { %v61_v16 = vpop.permute.xlu0 %60 }
  0x90   :  { %vm63_vm4 = vcmp.eq.s32.totalorder %v55_v13, %v61_v16 }
  0x91   :  { %v2165_v17 = vsel %vm63_vm4, 1.0, %v2661_v1 }
  0x92   :  { %2309 = vmatmul.mubr.msk.f32.vlgmr.msra.gmra.mxu0 %vm71_vm2, %v2165_v17 }
  0x93   :  { %2312 = vmatpush3.msra.mxu0 %v158_v9 }
  0x94   :  { %2313 = vmatprep.subr.mxu0 %v157_v18 }
  0x95   :  { %2314 = vmatpush3.msra.mxu0 %v157_v18 }
  0x96   :  { %2329 = vmatprep.subr.mxu0 %v2661_v1 }
  0xda   :  { %v323_v20 = vpop.f32.mrf.mxu1 }
  0xdb   :  { %v342_v23 = vadd.f32 %v2795_v22, %v323_v20 }
  0xdc   :  { %v2328_v21 = vpop.f32.mrf.mxu1 }
  0xdd   :  { %344 = vrot.lane.b32.xlu1 %v342_v23, %s2663_s21 }
 0x14f   :  { %v345_v35 = vpop.permute.xlu1 %344 }
 0x152   :  { %v2310_v24 = vpop.f32.mrf.mxu0 }
 0x154   :  { %v148_v25 = vpop.f32.mrf.mxu0 }
 0x155   :  { %2315 = vmatprep.mubr.msk.f32.mxu0 %vm166_vm5, %v148_v25 }
 0x156   :  { %2316 = vmatmul.mubr.msk.f32.vlgmr.msra.gmra.mxu0 %vm166_vm5, %v2310_v24 }
 0x157   :  { %2330 = vmatpush3.msra.mxu0 %v2750_v7  ;;  %2337 = vmatprep.mubr.msk.f32.mxu0 %vm2662_vm1, %v2661_v1 }
 0x158   :  { %2331 = vmatprep.subr.mxu0 %v2661_v1 }
 0x159   :  { %2332 = vmatpush3.msra.mxu0 %v2756_v8 }
 0x15a   :  { %2333 = vmatprep.subr.mxu0 %v2661_v1 }
 0x15b   :  { %2334 = vmatpush3.msra.mxu0 %v2762_v10 }
 0x15c   :  { %2335 = vmatprep.subr.mxu0 %v2661_v1 }
 0x15d   :  { %2336 = vmatpush3.msra.mxu0 %v2771_v11 }
 0x15e   :  { %2351 = vmatprep.subr.mxu0 %v2661_v1 }
 0x216   :  { %v2317_v27 = vpop.f32.mrf.mxu0 }
 0x217   :  { %v2812_v28 = vadd.f32 %v2317_v27, %v2169_v26 }
 0x218   :  { %v239_v29 = vpop.f32.mrf.mxu0 }
 0x219   :  { %v2814_v30 = vadd.f32 %v2169_v26, %v239_v29 }
 0x21b   :  { %v327_v31 = vadd.f32 %v323_v20, %v2814_v30 }
 0x21d   :  { %v2172_v32 = vmul.f32 -1.442695, %v327_v31 }
 0x21f   :  { %2517 = vpow2.f32 %v2172_v32 }
 0x22c   :  { %v2518_v33 = vpop.eup %2517 }
 0x22d   :  { %v331_v34 = vadd.f32 1.0, %v2518_v33 }
 0x22f   :  { %2519 = vrcp.f32 %v331_v34 }
 0x23c   :  { %v2520_v36 = vpop.eup %2519 }
 0x23d   :  { %v347_v37 = vmul.f32 %v2520_v36, %v345_v35  ;;  %v354_v41 = vsub.f32 1.0, %v2520_v36  ;;  %v360_v43 = vmul.f32 0.0, %v2520_v36 }
 0x23f   :  { %349 = vrot.lane.b32.xlu0 %v347_v37, %s2663_s21 }
 0x2b1   :  { %v350_v38 = vpop.permute.xlu0 %349 }
 0x2b2   :  { %v352_v39 = vadd.f32 %v350_v38, %v2814_v30 }
 0x2b4   :  { %2521 = vtanh.f32 %v352_v39 }
 0x2c1   :  { %v2522_v40 = vpop.eup %2521 }
 0x2c2   :  { %356 = vrot.lane.b32.xlu1 %v2522_v40, %s2664_s4 }
 0x334   :  { %v357_v42 = vpop.permute.xlu1 %356 }
 0x335   :  { %v359_v44 = vmul.f32 %v357_v42, %v354_v41 }
 0x337   :  { %v361_v45 = vadd.f32 %v360_v43, %v359_v44 }
 0x339   :  { %363 = vrot.lane.b32.xlu0 %v361_v45, %s2664_s4  ;;  %v469_v62 = vrot.slane %v361_v45, 6 }
 0x3ab   :  { %v364_v46 = vpop.permute.xlu0 %363 }
 0x3ac   :  { %367 = vst.msk [vmem:[#allocation2] sm:$0x3] %vm366_vm6, %v364_v46  ;;  %2338 = vmatmul.mubr.msk.f32.vlgmr.msra.gmra.mxu0 %vm253_vm7, %v364_v46 }
 0x3ad   :  { %2352 = vmatpush3.msra.mxu0 %v2750_v7  ;;  %2359 = vmatprep.mubr.msk.f32.mxu0 %vm2662_vm1, %v2661_v1 }
 0x3ae   :  { %2353 = vmatprep.subr.mxu0 %v2661_v1 }
 0x3af   :  { %2354 = vmatpush3.msra.mxu0 %v2756_v8 }
 0x3b0   :  { %2355 = vmatprep.subr.mxu0 %v2661_v1 }
 0x3b1   :  { %2356 = vmatpush3.msra.mxu0 %v2762_v10 }
 0x3b2   :  { %2357 = vmatprep.subr.mxu0 %v2661_v1 }
 0x3b3   :  { %2358 = vmatpush3.msra.mxu0 %v2771_v11 }
 0x3b4   :  { %2373 = vmatprep.subr.mxu0 %v2661_v1 }
 0x46c   :  { %v436_v47 = vpop.f32.mrf.mxu0 }
 0x46d   :  { %v450_v48 = vadd.f32 %v436_v47, %v2795_v22  ;;  %v441_v51 = vrot.slane %v436_v47, 6 }
 0x46e   :  { %v2339_v49 = vpop.f32.mrf.mxu0 }
 0x46f   :  { %v452_v50 = vrot.slane %v450_v48, 6  ;;  %v443_v52 = vadd.f32 %v441_v51, %v2814_v30 }
 0x471   :  { %453 = vrot.lane.b32.xlu1 %v452_v50, %s2663_s21  ;;  %v2175_v53 = vmul.f32 -1.442695, %v443_v52 }
 0x473   :  { %2523 = vpow2.f32 %v2175_v53 }
 0x480   :  { %v2524_v54 = vpop.eup %2523 }
 0x481   :  { %v447_v55 = vadd.f32 1.0, %v2524_v54 }
 0x483   :  { %2525 = vrcp.f32 %v447_v55 }
 0x490   :  { %v2526_v56 = vpop.eup %2525 }
 0x491   :  { %v463_v63 = vsub.f32 1.0, %v2526_v56  ;;  %v471_v3 = vmul.f32 %v2526_v56, %v469_v62 }
 0x4e3   :  { %v454_v57 = vpop.permute.xlu1 %453 }
 0x4e4   :  { %v456_v58 = vmul.f32 %v2526_v56, %v454_v57 }
 0x4e6   :  { %458 = vrot.lane.b32.xlu0 %v456_v58, %s2663_s21 }
 0x558   :  { %v459_v59 = vpop.permute.xlu0 %458 }
 0x559   :  { %v461_v60 = vadd.f32 %v459_v59, %v2814_v30 }
 0x55b   :  { %2527 = vtanh.f32 %v461_v60 }
 0x568   :  { %v2528_v61 = vpop.eup %2527 }
 0x569   :  { %465 = vrot.lane.b32.xlu1 %v2528_v61, %s2664_s4 }
 0x5db   :  { %v466_v0 = vpop.permute.xlu1 %465 }
 0x5dc   :  { %v468_v2 = vmul.f32 %v466_v0, %v463_v63 }
 0x5de   :  { %v2839_v4 = vadd.f32 %v471_v3, %v468_v2 }
 0x5e0   :  { %v479_v5 = vrot.slane %v2839_v4, 2  ;;  %v583_v29 = vrot.slane %v2839_v4, 6 }
 0x5e2   :  { %480 = vrot.lane.b32.xlu0 %v479_v5, %s2664_s4 }
 0x654   :  { %v481_v6 = vpop.permute.xlu0 %480 }
 0x655   :  { %2349 = vmatmul.mubr.msk.f32.vlgmr.msra.gmra.mxu1 %vm253_vm7, %v481_v6 }
 0x656   :  { %2363 = vmatpush3.msra.mxu1 %v2750_v7  ;;  %2370 = vmatprep.mubr.msk.f32.mxu1 %vm2662_vm1, %v2661_v1 }
 0x657   :  { %2364 = vmatprep.subr.mxu1 %v2661_v1 }
 0x658   :  { %2365 = vmatpush3.msra.mxu1 %v2756_v8 }
 0x659   :  { %2366 = vmatprep.subr.mxu1 %v2661_v1 }
 0x65a   :  { %2367 = vmatpush3.msra.mxu1 %v2762_v10 }
 0x65b   :  { %2368 = vmatprep.subr.mxu1 %v2661_v1 }
 0x65c   :  { %2369 = vmatpush3.msra.mxu1 %v2771_v11 }
 0x65d   :  { %2384 = vmatprep.subr.mxu1 %v2661_v1 }
 0x715   :  { %v550_v9 = vpop.f32.mrf.mxu1 }
 0x716   :  { %v564_v12 = vadd.f32 %v550_v9, %v2795_v22  ;;  %v555_v15 = vrot.slane %v550_v9, 4 }
 0x717   :  { %v2350_v13 = vpop.f32.mrf.mxu1 }
 0x718   :  { %v566_v14 = vrot.slane %v564_v12, 4  ;;  %v557_v16 = vadd.f32 %v555_v15, %v2814_v30 }
 0x71a   :  { %567 = vrot.lane.b32.xlu1 %v566_v14, %s2663_s21  ;;  %v2177_v17 = vmul.f32 -1.442695, %v557_v16 }
 0x71c   :  { %2529 = vpow2.f32 %v2177_v17 }
 0x729   :  { %v2530_v18 = vpop.eup %2529 }
 0x72a   :  { %v561_v19 = vadd.f32 1.0, %v2530_v18 }
 0x72c   :  { %2531 = vrcp.f32 %v561_v19 }
 0x739   :  { %v2532_v20 = vpop.eup %2531 }
 0x73a   :  { %v577_v27 = vsub.f32 1.0, %v2532_v20  ;;  %v585_v32 = vmul.f32 %v2532_v20, %v583_v29 }
 0x78c   :  { %v568_v21 = vpop.permute.xlu1 %567 }
 0x78d   :  { %v570_v23 = vmul.f32 %v2532_v20, %v568_v21 }
 0x78f   :  { %572 = vrot.lane.b32.xlu0 %v570_v23, %s2663_s21 }
 0x801   :  { %v573_v24 = vpop.permute.xlu0 %572 }
 0x802   :  { %v575_v25 = vadd.f32 %v573_v24, %v2814_v30 }
 0x804   :  { %2533 = vtanh.f32 %v575_v25 }
 0x811   :  { %v2534_v26 = vpop.eup %2533 }
 0x812   :  { %579 = vrot.lane.b32.xlu1 %v2534_v26, %s2664_s4 }
 0x884   :  { %v580_v31 = vpop.permute.xlu1 %579 }
 0x885   :  { %v582_v33 = vmul.f32 %v580_v31, %v577_v27 }
 0x887   :  { %v2861_v34 = vadd.f32 %v585_v32, %v582_v33 }
 0x889   :  { %v593_v35 = vrot.slane %v2861_v34, 4  ;;  %v697_v53 = vrot.slane %v2861_v34, 6 }
 0x88b   :  { %594 = vrot.lane.b32.xlu0 %v593_v35, %s2664_s4 }
 0x8fd   :  { %v595_v36 = vpop.permute.xlu0 %594 }
 0x8fe   :  { %2360 = vmatmul.mubr.msk.f32.vlgmr.msra.gmra.mxu0 %vm253_vm7, %v595_v36 }
 0x8ff   :  { %2374 = vmatpush3.msra.mxu0 %v2750_v7  ;;  %2381 = vmatprep.mubr.msk.f32.mxu0 %vm2662_vm1, %v2661_v1 }
 0x900   :  { %2375 = vmatprep.subr.mxu0 %v2661_v1 }
 0x901   :  { %2376 = vmatpush3.msra.mxu0 %v2756_v8 }
 0x902   :  { %2377 = vmatprep.subr.mxu0 %v2661_v1 }
 0x903   :  { %2378 = vmatpush3.msra.mxu0 %v2762_v10 }
 0x904   :  { %2379 = vmatprep.subr.mxu0 %v2661_v1 }
 0x905   :  { %2380 = vmatpush3.msra.mxu0 %v2771_v11 }
 0x906   :  { %2395 = vmatprep.subr.mxu0 %v2661_v1 }
 0x9be   :  { %v664_v37 = vpop.f32.mrf.mxu0 }
 0x9bf   :  { %v678_v38 = vadd.f32 %v664_v37, %v2795_v22  ;;  %v669_v41 = vrot.slane %v664_v37, 2 }
 0x9c0   :  { %v2361_v39 = vpop.f32.mrf.mxu0 }
 0x9c1   :  { %v680_v40 = vrot.slane %v678_v38, 2  ;;  %v671_v42 = vadd.f32 %v669_v41, %v2814_v30 }
 0x9c3   :  { %681 = vrot.lane.b32.xlu1 %v680_v40, %s2663_s21  ;;  %v2179_v43 = vmul.f32 -1.442695, %v671_v42 }
 0x9c5   :  { %2535 = vpow2.f32 %v2179_v43 }
 0x9d2   :  { %v2536_v44 = vpop.eup %2535 }
 0x9d3   :  { %v675_v45 = vadd.f32 1.0, %v2536_v44 }
 0x9d5   :  { %2537 = vrcp.f32 %v675_v45 }
 0x9e2   :  { %v2538_v46 = vpop.eup %2537 }
 0x9e3   :  { %v691_v52 = vsub.f32 1.0, %v2538_v46  ;;  %v699_v55 = vmul.f32 %v2538_v46, %v697_v53 }
 0xa35   :  { %v682_v47 = vpop.permute.xlu1 %681 }
 0xa36   :  { %v684_v48 = vmul.f32 %v2538_v46, %v682_v47 }
 0xa38   :  { %686 = vrot.lane.b32.xlu0 %v684_v48, %s2663_s21 }
 0xaaa   :  { %v687_v49 = vpop.permute.xlu0 %686 }
 0xaab   :  { %v689_v50 = vadd.f32 %v687_v49, %v2814_v30 }
 0xaad   :  { %2539 = vtanh.f32 %v689_v50 }
 0xaba   :  { %v2540_v51 = vpop.eup %2539 }
 0xabb   :  { %693 = vrot.lane.b32.xlu1 %v2540_v51, %s2664_s4 }
 0xb2d   :  { %v694_v54 = vpop.permute.xlu1 %693 }
 0xb2e   :  { %v696_v56 = vmul.f32 %v694_v54, %v691_v52 }
 0xb30   :  { %v2883_v57 = vadd.f32 %v699_v55, %v696_v56 }
 0xb32   :  { %v707_v58 = vrot.slane %v2883_v57, 6 }
 0xb34   :  { %708 = vrot.lane.b32.xlu0 %v707_v58, %s2664_s4 }
 0xba6   :  { %v709_v59 = vpop.permute.xlu0 %708 }
 0xba7   :  { %2371 = vmatmul.mubr.msk.f32.vlgmr.msra.gmra.mxu1 %vm253_vm7, %v709_v59 }
 0xba8   :  { %2385 = vmatpush3.msra.mxu1 %v2750_v7  ;;  %2392 = vmatprep.mubr.msk.f32.mxu1 %vm2662_vm1, %v2661_v1 }
 0xba9   :  { %2386 = vmatprep.subr.mxu1 %v2661_v1 }
 0xbaa   :  { %2387 = vmatpush3.msra.mxu1 %v2756_v8 }
 0xbab   :  { %2388 = vmatprep.subr.mxu1 %v2661_v1 }
 0xbac   :  { %2389 = vmatpush3.msra.mxu1 %v2762_v10 }
 0xbad   :  { %2390 = vmatprep.subr.mxu1 %v2661_v1 }
 0xbae   :  { %2391 = vmatpush3.msra.mxu1 %v2771_v11 }
 0xc67   :  { %v778_v30 = vpop.f32.mrf.mxu1 }
 0xc68   :  { %v789_v60 = vadd.f32 %v778_v30, %v2795_v22  ;;  %v782_v62 = vadd.f32 %v778_v30, %v2812_v28 }
 0xc69   :  { %v2372_v61 = vpop.f32.mrf.mxu1 }
 0xc6a   :  { %791 = vrot.lane.b32.xlu1 %v789_v60, %s2663_s21  ;;  %v2181_v63 = vmul.f32 -1.442695, %v782_v62 }
 0xc6c   :  { %2541 = vpow2.f32 %v2181_v63 }
 0xc79   :  { %v2542_v0 = vpop.eup %2541 }
 0xc7a   :  { %v786_v2 = vadd.f32 1.0, %v2542_v0 }
 0xc7c   :  { %2543 = vrcp.f32 %v786_v2 }
 0xc89   :  { %v2544_v3 = vpop.eup %2543 }
 0xc8a   :  { %v801_v14 = vsub.f32 1.0, %v2544_v3  ;;  %v808_v16 = vmul.f32 %v2544_v3, %v707_v58 }
 0xcdc   :  { %v792_v5 = vpop.permute.xlu1 %791 }
 0xcdd   :  { %v794_v6 = vmul.f32 %v2544_v3, %v792_v5 }
 0xcdf   :  { %796 = vrot.lane.b32.xlu0 %v794_v6, %s2663_s21 }
 0xd51   :  { %v797_v9 = vpop.permute.xlu0 %796 }
 0xd52   :  { %v799_v12 = vadd.f32 %v797_v9, %v2812_v28 }
 0xd54   :  { %2545 = vtanh.f32 %v799_v12 }
 0xd61   :  { %v2546_v13 = vpop.eup %2545 }
 0xd62   :  { %803 = vrot.lane.b32.xlu1 %v2546_v13, %s2664_s4 }
 0xdd4   :  { %v804_v15 = vpop.permute.xlu1 %803 }
 0xdd5   :  { %v806_v17 = vmul.f32 %v804_v15, %v801_v14 }
 0xdd7   :  { %v809_v18 = vadd.f32 %v808_v16, %v806_v17 }
 0xdd9   :  { %811 = vrot.lane.b32.xlu0 %v809_v18, %s2664_s4  ;;  %v916_v35 = vrot.slane %v809_v18, 6 }
 0xe4b   :  { %v812_v19 = vpop.permute.xlu0 %811 }
 0xe4c   :  { %814 = vst.msk [vmem:[#allocation2 + $0x8] sm:$0x3] %vm366_vm6, %v812_v19  ;;  %2382 = vmatmul.mubr.msk.f32.vlgmr.msra.gmra.mxu0 %vm253_vm7, %v812_v19 }
 0xe4d   :  { %2396 = vmatpush3.msra.mxu0 %v2750_v7  ;;  %2403 = vmatprep.mubr.msk.f32.mxu0 %vm2662_vm1, %v2661_v1 }
 0xe4e   :  { %2397 = vmatprep.subr.mxu0 %v2661_v1 }
 0xe4f   :  { %2398 = vmatpush3.msra.mxu0 %v2756_v8 }
 0xe50   :  { %2399 = vmatprep.subr.mxu0 %v2661_v1 }
 0xe51   :  { %2400 = vmatpush3.msra.mxu0 %v2762_v10 }
 0xe52   :  { %2401 = vmatprep.subr.mxu0 %v2661_v1 }
 0xe53   :  { %2402 = vmatpush3.msra.mxu0 %v2771_v11 }
 0xe54   :  { %2417 = vmatprep.subr.mxu0 %v2661_v1 }
 0xf0c   :  { %v883_v20 = vpop.f32.mrf.mxu0 }
 0xf0d   :  { %v897_v7 = vadd.f32 %v883_v20, %v2795_v22  ;;  %v888_v24 = vrot.slane %v883_v20, 6 }
 0xf0e   :  { %v2383_v21 = vpop.f32.mrf.mxu0 }
 0xf0f   :  { %v899_v23 = vrot.slane %v897_v7, 6  ;;  %v890_v8 = vadd.f32 %v888_v24, %v2812_v28  ;;  %v2974_v24 = vld [vmem:[%s3226_s7 + $0x8] sm:$0xff] }
 0xf11   :  { %900 = vrot.lane.b32.xlu1 %v899_v23, %s2663_s21  ;;  %v2183_v25 = vmul.f32 -1.442695, %v890_v8  ;;  %v2961_v23 = vld [vmem:[%s3226_s7 + $0x18] sm:$0xff]  ;;  %v2981_v8 = vld [vmem:[%s3226_s7] sm:$0xff] }
 0xf13   :  { %2547 = vpow2.f32 %v2183_v25  ;;  %v1155_v25 = vld [vmem:[%s3225_s6 + $0x10] sm:$0xff] }
 0xf20   :  { %v2548_v26 = vpop.eup %2547 }
 0xf21   :  { %v894_v10 = vadd.f32 1.0, %v2548_v26  ;;  %v1154_v26 = vld [vmem:[%s3225_s6 + $0x8] sm:$0xff] }
 0xf23   :  { %2549 = vrcp.f32 %v894_v10  ;;  %v2192_v10 = vld [vmem:[%s3228_s9] ss:$0 sm:$0xff] }
 0xf30   :  { %v2550_v27 = vpop.eup %2549 }
 0xf31   :  { %v910_v36 = vsub.f32 1.0, %v2550_v27  ;;  %v918_v39 = vmul.f32 %v2550_v27, %v916_v35 }
 0xf83   :  { %v901_v29 = vpop.permute.xlu1 %900 }
 0xf84   :  { %v903_v11 = vmul.f32 %v2550_v27, %v901_v29  ;;  %v1153_v27 = vld [vmem:[%s3225_s6] sm:$0xff] }
 0xf86   :  { %905 = vrot.lane.b32.xlu0 %v903_v11, %s2663_s21 }
 0xff8   :  { %v906_v31 = vpop.permute.xlu0 %905 }
 0xff9   :  { %v908_v32 = vadd.f32 %v906_v31, %v2812_v28 }
 0xffb   :  { %2551 = vtanh.f32 %v908_v32 }
0x1008   :  { %v2552_v33 = vpop.eup %2551 }
0x1009   :  { %912 = vrot.lane.b32.xlu1 %v2552_v33, %s2664_s4 }
0x107b   :  { %v913_v37 = vpop.permute.xlu1 %912 }
0x107c   :  { %v915_v38 = vmul.f32 %v913_v37, %v910_v36 }
0x107e   :  { %v2922_v40 = vadd.f32 %v918_v39, %v915_v38 }
0x1080   :  { %v925_v41 = vrot.slane %v2922_v40, 2  ;;  %v1029_v30 = vrot.slane %v2922_v40, 6 }
0x1082   :  { %926 = vrot.lane.b32.xlu0 %v925_v41, %s2664_s4 }
0x10f4   :  { %v927_v42 = vpop.permute.xlu0 %926 }
0x10f5   :  { %2393 = vmatmul.mubr.msk.f32.vlgmr.msra.gmra.mxu1 %vm253_vm7, %v927_v42 }
0x11b5   :  { %v996_v43 = vpop.f32.mrf.mxu1 }
0x11b6   :  { %v1010_v44 = vadd.f32 %v996_v43, %v2795_v22  ;;  %v1001_v47 = vrot.slane %v996_v43, 4 }
0x11b7   :  { %v2394_v45 = vpop.f32.mrf.mxu1 }
0x11b8   :  { %v1012_v46 = vrot.slane %v1010_v44, 4  ;;  %v1003_v48 = vadd.f32 %v1001_v47, %v2812_v28  ;;  %v2188_v45 = vld [vmem:[%s3227_s8] ss:$0 sm:$0xff] }
0x11ba   :  { %1013 = vrot.lane.b32.xlu1 %v1012_v46, %s2663_s21  ;;  %v2185_v49 = vmul.f32 -1.442695, %v1003_v48 }
0x11bc   :  { %2553 = vpow2.f32 %v2185_v49 }
0x11c9   :  { %v2554_v50 = vpop.eup %2553 }
0x11ca   :  { %v1007_v51 = vadd.f32 1.0, %v2554_v50 }
0x11cc   :  { %2555 = vrcp.f32 %v1007_v51 }
0x11d9   :  { %v2556_v52 = vpop.eup %2555 }
0x11da   :  { %v1023_v59 = vsub.f32 1.0, %v2556_v52  ;;  %v1031_v61 = vmul.f32 %v2556_v52, %v1029_v30 }
0x122c   :  { %v1014_v53 = vpop.permute.xlu1 %1013 }
0x122d   :  { %v1016_v54 = vmul.f32 %v2556_v52, %v1014_v53 }
0x122f   :  { %1018 = vrot.lane.b32.xlu0 %v1016_v54, %s2663_s21 }
0x12a1   :  { %v1019_v55 = vpop.permute.xlu0 %1018 }
0x12a2   :  { %v1021_v56 = vadd.f32 %v1019_v55, %v2812_v28 }
0x12a4   :  { %2557 = vtanh.f32 %v1021_v56 }
0x12b1   :  { %v2558_v58 = vpop.eup %2557 }
0x12b2   :  { %1025 = vrot.lane.b32.xlu1 %v2558_v58, %s2664_s4 }
0x1324   :  { %v1026_v60 = vpop.permute.xlu1 %1025 }
0x1325   :  { %v1028_v62 = vmul.f32 %v1026_v60, %v1023_v59 }
0x1327   :  { %v2934_v63 = vadd.f32 %v1031_v61, %v1028_v62 }
0x1329   :  { %v1038_v0 = vrot.slane %v2934_v63, 4  ;;  %v1142_v11 = vrot.slane %v2934_v63, 6 }
0x132b   :  { %1039 = vrot.lane.b32.xlu0 %v1038_v0, %s2664_s4 }
0x139d   :  { %v1040_v2 = vpop.permute.xlu0 %1039 }
0x139e   :  { %2404 = vmatmul.mubr.msk.f32.vlgmr.msra.gmra.mxu0 %vm253_vm7, %v1040_v2 }
0x139f   :  { %2425 = vmatprep.mubr.msk.f32.mxu0 %vm2662_vm1, %v2661_v1  ;;  %2418 = vmatpush3.msra.mxu0 %v2961_v23 }
0x13a0   :  { %2419 = vmatprep.subr.mxu0 %v2661_v1 }
0x145e   :  { %v1109_v3 = vpop.f32.mrf.mxu0 }
0x145f   :  { %v1123_v5 = vadd.f32 %v1109_v3, %v2795_v22  ;;  %v1114_v12 = vrot.slane %v1109_v3, 2 }
0x1460   :  { %v2405_v6 = vpop.f32.mrf.mxu0 }
0x1461   :  { %v1125_v9 = vrot.slane %v1123_v5, 2  ;;  %v1116_v13 = vadd.f32 %v1114_v12, %v2812_v28 }
0x1463   :  { %1126 = vrot.lane.b32.xlu1 %v1125_v9, %s2663_s21  ;;  %v2187_v14 = vmul.f32 -1.442695, %v1116_v13 }
0x1465   :  { %2559 = vpow2.f32 %v2187_v14 }
0x1472   :  { %v2560_v15 = vpop.eup %2559 }
0x1473   :  { %v1120_v16 = vadd.f32 1.0, %v2560_v15 }
0x1475   :  { %2561 = vrcp.f32 %v1120_v16 }
0x1482   :  { %v2944_v17 = vpop.eup %2561 }
0x1483   :  { %v1136_v29 = vsub.f32 1.0, %v2944_v17  ;;  %v1144_v32 = vmul.f32 %v2944_v17, %v1142_v11 }
0x14d5   :  { %v1127_v18 = vpop.permute.xlu1 %1126 }
0x14d6   :  { %v1129_v19 = vmul.f32 %v2944_v17, %v1127_v18 }
0x14d8   :  { %1131 = vrot.lane.b32.xlu0 %v1129_v19, %s2663_s21 }
0x14dc   :  { %474 = vrot.lane.b32.xlu0 %v2839_v4, %s2664_s4 }
0x14e0   :  { %702 = vrot.lane.b32.xlu0 %v2883_v57, %s2664_s4 }
0x14e4   :  { %1034 = vrot.lane.b32.xlu0 %v2934_v63, %s2664_s4 }
0x14e8   :  { %1332 = vrot.lane.b32.xlu0 %v2192_v10, %s2663_s21 }
0x154a   :  { %v1132_v22 = vpop.permute.xlu0 %1131 }
0x154b   :  { %v1134_v20 = vadd.f32 %v1132_v22, %v2812_v28  ;;  %v2966_v28 = vld [vmem:[%s3226_s7 + $0x10] sm:$0xff]  ;;  %s2633_s7 = scalar_lea.vmem %s2151_s28, 64 }
0x154c   :  { %2420 = vmatpush3.msra.mxu0 %v2966_v28  ;;  %p2634_p5 = scmp.ne.s32.totalorder %s2151_s28, %s2633_s7  ;;  %p2639_p7 = scmp.lt.s32.totalorder %s2633_s7, %s2633_s7 }
0x154d   :  { %2563 = vtanh.f32 %v1134_v20  ;;  %2421 = vmatprep.subr.mxu0 %v2661_v1 }
0x154e   :  { %v475_v7 = vpop.permute.xlu0 %474  ;;  %2422 = vmatpush3.msra.mxu0 %v2974_v24  ;;  %p2640_p8 = por %p2639_p7, %p2638_p6 }
0x154f   :  { %478 = vst.msk [vmem:[#allocation2] sm:$0xc] %vm477_vm8, %v475_v7  ;;  %2423 = vmatprep.subr.mxu0 %v2661_v1 }
0x1550   :  { %2424 = vmatpush3.msra.mxu0 %v2981_v8  ;;  %p2641_p9 = pnand %p2640_p8, %p2634_p5 }
0x1551   :  { %2426 = vmatmul.mubr.f32.vlgmr.msra.gmra.mxu0 %v2661_v1  ;;  %2439 = vmatprep.subr.mxu0 %v2661_v1 }
0x1552   :  { %v703_v21 = vpop.permute.xlu0 %702  ;;  %2440 = vmatpush3.msra.mxu0 %v2961_v23  ;;  %2447 = vmatprep.mubr.msk.f32.mxu0 %vm2662_vm1, %v2661_v1 }
0x1553   :  { %706 = vst.msk [vmem:[#allocation2] sm:$0xc0] %vm705_vm9, %v703_v21  ;;  %2441 = vmatprep.subr.mxu0 %v2661_v1 }
0x1554   :  { %2442 = vmatpush3.msra.mxu0 %v2966_v28 }
0x1555   :  { %2443 = vmatprep.subr.mxu0 %v2661_v1 }
0x1556   :  { %v1035_v4 = vpop.permute.xlu0 %1034  ;;  %2444 = vmatpush3.msra.mxu0 %v2974_v24 }
0x1557   :  { %1037 = vst.msk [vmem:[#allocation2 + $0x8] sm:$0x30] %vm591_vm10, %v1035_v4  ;;  %2445 = vmatprep.subr.mxu0 %v2661_v1 }
0x1558   :  { %2446 = vmatpush3.msra.mxu0 %v2981_v8 }
0x1559   :  { %2461 = vmatprep.subr.mxu0 %v2661_v1 }
0x155a   :  { %v2564_v57 = vpop.eup %2563  ;;  %v3026_v41 = vpop.permute.xlu0 %1332 }
0x155b   :  { %1138 = vrot.lane.b32.xlu1 %v2564_v57, %s2664_s4 }
0x155f   :  { %588 = vrot.lane.b32.xlu1 %v2861_v34, %s2664_s4  ;;  %v1156_v34 = vld [vmem:[%s3225_s6 + $0x18] sm:$0xff] }
0x1560   :  { %2406 = vmatprep.subr.mxu1 %v1156_v34 }
0x1561   :  { %2407 = vmatpush3.msra.mxu1 %v1156_v34 }
0x1562   :  { %2408 = vmatprep.subr.mxu1 %v1155_v25 }
0x1563   :  { %921 = vrot.lane.b32.xlu1 %v2922_v40, %s2664_s4  ;;  %2409 = vmatpush3.msra.mxu1 %v1155_v25 }
0x1564   :  { %2410 = vmatprep.subr.mxu1 %v1154_v26 }
0x1565   :  { %2411 = vmatpush3.msra.mxu1 %v1154_v26 }
0x1566   :  { %2412 = vmatprep.subr.mxu1 %v1153_v27 }
0x1567   :  { %2413 = vmatpush3.msra.mxu1 %v1153_v27 }
0x1568   :  { %2428 = vmatprep.subr.mxu1 %v2661_v1 }
0x15cd   :  { %v1139_v31 = vpop.permute.xlu1 %1138 }
0x15ce   :  { %v1141_v33 = vmul.f32 %v1139_v31, %v1136_v29 }
0x15d0   :  { %v1145_v35 = vadd.f32 %v1144_v32, %v1141_v33 }
0x15d1   :  { %v589_v36 = vpop.permute.xlu1 %588 }
0x15d2   :  { %592 = vst.msk [vmem:[#allocation2] sm:$0x30] %vm591_vm10, %v589_v36  ;;  %1147 = vrot.lane.b32.xlu1 %v1145_v35, %s2664_s4 }
0x15d5   :  { %v922_v37 = vpop.permute.xlu1 %921 }
0x15d6   :  { %924 = vst.msk [vmem:[#allocation2 + $0x8] sm:$0xc] %vm477_vm8, %v922_v37 }
0x15d9   :  { %v1151_v38 = vld [vmem:[#allocation2] sm:$0xff] }
0x15da   :  { %2414 = vmatprep.mubr.msk.f32.mxu1 %vm253_vm7, %v1151_v38 }
0x1611   :  { %v1316_v39 = vpop.f32.mrf.mxu0 }
0x1612   :  { %v1335_v42 = vadd.f32 %v3026_v41, %v1316_v39 }
0x1613   :  { %v2427_v40 = vpop.f32.mrf.mxu0 }
0x1614   :  { %1337 = vrot.lane.b32.xlu1 %v1335_v42, %s2663_s21 }
0x1644   :  { %v1148_v43 = vpop.permute.xlu1 %1147 }
0x1645   :  { %1150 = vst.msk [vmem:[#allocation2 + $0x8] sm:$0xc0] %vm705_vm9, %v1148_v43  ;;  %2140 = vst.msk [vmem:[#allocation6 - $0x6] sm:$0xc0] %vm705_vm9, %v1148_v43 }
0x164c   :  { %v1152_v44 = vld [vmem:[#allocation2 + $0x8] sm:$0xff] }
0x164d   :  { %2415 = vmatmul.mubr.msk.f32.vlgmr.msra.gmra.mxu1 %vm253_vm7, %v1152_v44 }
0x164e   :  { %2429 = vmatpush3.msra.mxu1 %v2961_v23  ;;  %2436 = vmatprep.mubr.msk.f32.mxu1 %vm2662_vm1, %v2661_v1 }
0x164f   :  { %2430 = vmatprep.subr.mxu1 %v2661_v1 }
0x1650   :  { %2431 = vmatpush3.msra.mxu1 %v2966_v28 }
0x1651   :  { %2432 = vmatprep.subr.mxu1 %v2661_v1 }
0x1652   :  { %2433 = vmatpush3.msra.mxu1 %v2974_v24 }
0x1653   :  { %2434 = vmatprep.subr.mxu1 %v2661_v1 }
0x1654   :  { %2435 = vmatpush3.msra.mxu1 %v2981_v8 }
0x1655   :  { %2450 = vmatprep.subr.mxu1 %v2661_v1 }
0x1686   :  { %v1338_v54 = vpop.permute.xlu1 %1337 }
0x170d   :  { %v2416_v46 = vpop.f32.mrf.mxu1 }
0x170e   :  { %v3046_v47 = vadd.f32 %v2416_v46, %v2188_v45 }
0x170f   :  { %v1236_v48 = vpop.f32.mrf.mxu1 }
0x1710   :  { %v3048_v49 = vadd.f32 %v2188_v45, %v1236_v48 }
0x1712   :  { %v1320_v50 = vadd.f32 %v1316_v39, %v3048_v49 }
0x1714   :  { %v2191_v51 = vmul.f32 -1.442695, %v1320_v50 }
0x1716   :  { %2565 = vpow2.f32 %v2191_v51 }
0x1723   :  { %v2566_v52 = vpop.eup %2565 }
0x1724   :  { %v1324_v53 = vadd.f32 1.0, %v2566_v52 }
0x1726   :  { %2567 = vrcp.f32 %v1324_v53 }
0x1733   :  { %v2568_v55 = vpop.eup %2567 }
0x1734   :  { %v1340_v56 = vmul.f32 %v2568_v55, %v1338_v54  ;;  %v1347_v60 = vsub.f32 1.0, %v2568_v55  ;;  %v1353_v62 = vmul.f32 0.0, %v2568_v55 }
0x1736   :  { %1342 = vrot.lane.b32.xlu0 %v1340_v56, %s2663_s21 }
0x17a8   :  { %v1343_v58 = vpop.permute.xlu0 %1342 }
0x17a9   :  { %v1345_v59 = vadd.f32 %v1343_v58, %v3048_v49 }
0x17ab   :  { %2569 = vtanh.f32 %v1345_v59 }
0x17b8   :  { %v2570_v30 = vpop.eup %2569 }
0x17b9   :  { %1349 = vrot.lane.b32.xlu1 %v2570_v30, %s2664_s4 }
0x182b   :  { %v1350_v61 = vpop.permute.xlu1 %1349 }
0x182c   :  { %v1352_v63 = vmul.f32 %v1350_v61, %v1347_v60 }
0x182e   :  { %v1354_v0 = vadd.f32 %v1353_v62, %v1352_v63 }
0x1830   :  { %1356 = vrot.lane.b32.xlu0 %v1354_v0, %s2664_s4  ;;  %v1461_v21 = vrot.slane %v1354_v0, 6 }
0x18a2   :  { %v1357_v2 = vpop.permute.xlu0 %1356 }
0x18a3   :  { %1359 = vst.msk [vmem:[%s3229_s10] sm:$0x3] %vm366_vm6, %v1357_v2  ;;  %2437 = vmatmul.mubr.msk.f32.vlgmr.msra.gmra.mxu1 %vm253_vm7, %v1357_v2 }
0x18a4   :  { %2451 = vmatpush3.msra.mxu1 %v2961_v23  ;;  %2458 = vmatprep.mubr.msk.f32.mxu1 %vm2662_vm1, %v2661_v1 }
0x18a5   :  { %2452 = vmatprep.subr.mxu1 %v2661_v1 }
0x18a6   :  { %2453 = vmatpush3.msra.mxu1 %v2966_v28 }
0x18a7   :  { %2454 = vmatprep.subr.mxu1 %v2661_v1 }
0x18a8   :  { %2455 = vmatpush3.msra.mxu1 %v2974_v24 }
0x18a9   :  { %2456 = vmatprep.subr.mxu1 %v2661_v1 }
0x18aa   :  { %2457 = vmatpush3.msra.mxu1 %v2981_v8 }
0x18ab   :  { %2472 = vmatprep.subr.mxu1 %v2661_v1 }
0x1963   :  { %v1428_v3 = vpop.f32.mrf.mxu1 }
0x1964   :  { %v1442_v5 = vadd.f32 %v1428_v3, %v3026_v41  ;;  %v1433_v12 = vrot.slane %v1428_v3, 6 }
0x1965   :  { %v2438_v6 = vpop.f32.mrf.mxu1 }
0x1966   :  { %v1444_v9 = vrot.slane %v1442_v5, 6  ;;  %v1435_v13 = vadd.f32 %v1433_v12, %v3048_v49 }
0x1968   :  { %1445 = vrot.lane.b32.xlu1 %v1444_v9, %s2663_s21  ;;  %v2194_v14 = vmul.f32 -1.442695, %v1435_v13 }
0x196a   :  { %2571 = vpow2.f32 %v2194_v14 }
0x1977   :  { %v2572_v15 = vpop.eup %2571 }
0x1978   :  { %v1439_v16 = vadd.f32 1.0, %v2572_v15 }
0x197a   :  { %2573 = vrcp.f32 %v1439_v16 }
0x1987   :  { %v2574_v17 = vpop.eup %2573 }
0x1988   :  { %v1455_v4 = vsub.f32 1.0, %v2574_v17  ;;  %v1463_v25 = vmul.f32 %v2574_v17, %v1461_v21 }
0x19da   :  { %v1446_v18 = vpop.permute.xlu1 %1445 }
0x19db   :  { %v1448_v19 = vmul.f32 %v2574_v17, %v1446_v18 }
0x19dd   :  { %1450 = vrot.lane.b32.xlu0 %v1448_v19, %s2663_s21 }
0x1a4f   :  { %v1451_v22 = vpop.permute.xlu0 %1450 }
0x1a50   :  { %v1453_v20 = vadd.f32 %v1451_v22, %v3048_v49 }
0x1a52   :  { %2575 = vtanh.f32 %v1453_v20 }
0x1a5f   :  { %v2576_v7 = vpop.eup %2575 }
0x1a60   :  { %1457 = vrot.lane.b32.xlu1 %v2576_v7, %s2664_s4 }
0x1ad2   :  { %v1458_v57 = vpop.permute.xlu1 %1457 }
0x1ad3   :  { %v1460_v34 = vmul.f32 %v1458_v57, %v1455_v4 }
0x1ad5   :  { %v3076_v26 = vadd.f32 %v1463_v25, %v1460_v34 }
0x1ad7   :  { %v1470_v10 = vrot.slane %v3076_v26, 2  ;;  %v1574_v48 = vrot.slane %v3076_v26, 6 }
0x1ad9   :  { %1471 = vrot.lane.b32.xlu0 %v1470_v10, %s2664_s4 }
0x1b4b   :  { %v1472_v27 = vpop.permute.xlu0 %1471 }
0x1b4c   :  { %2448 = vmatmul.mubr.msk.f32.vlgmr.msra.gmra.mxu0 %vm253_vm7, %v1472_v27 }
0x1b4d   :  { %2462 = vmatpush3.msra.mxu0 %v2961_v23  ;;  %2469 = vmatprep.mubr.msk.f32.mxu0 %vm2662_vm1, %v2661_v1 }
0x1b4e   :  { %2463 = vmatprep.subr.mxu0 %v2661_v1 }
0x1b4f   :  { %2464 = vmatpush3.msra.mxu0 %v2966_v28 }
0x1b50   :  { %2465 = vmatprep.subr.mxu0 %v2661_v1 }
0x1b51   :  { %2466 = vmatpush3.msra.mxu0 %v2974_v24 }
0x1b52   :  { %2467 = vmatprep.subr.mxu0 %v2661_v1 }
0x1b53   :  { %2468 = vmatpush3.msra.mxu0 %v2981_v8 }
0x1b54   :  { %2483 = vmatprep.subr.mxu0 %v2661_v1 }
0x1c0c   :  { %v1541_v29 = vpop.f32.mrf.mxu0 }
0x1c0d   :  { %v1555_v11 = vadd.f32 %v1541_v29, %v3026_v41  ;;  %v1546_v33 = vrot.slane %v1541_v29, 4 }
0x1c0e   :  { %v2449_v31 = vpop.f32.mrf.mxu0 }
0x1c0f   :  { %v1557_v32 = vrot.slane %v1555_v11, 4  ;;  %v1548_v35 = vadd.f32 %v1546_v33, %v3048_v49 }
0x1c11   :  { %1558 = vrot.lane.b32.xlu1 %v1557_v32, %s2663_s21  ;;  %v2196_v36 = vmul.f32 -1.442695, %v1548_v35 }
0x1c13   :  { %2577 = vpow2.f32 %v2196_v36 }
0x1c20   :  { %v2578_v37 = vpop.eup %2577 }
0x1c21   :  { %v1552_v38 = vadd.f32 1.0, %v2578_v37 }
0x1c23   :  { %2579 = vrcp.f32 %v1552_v38 }
0x1c30   :  { %v2580_v39 = vpop.eup %2579 }
0x1c31   :  { %v1568_v46 = vsub.f32 1.0, %v2580_v39  ;;  %v1576_v51 = vmul.f32 %v2580_v39, %v1574_v48 }
0x1c83   :  { %v1559_v40 = vpop.permute.xlu1 %1558 }
0x1c84   :  { %v1561_v42 = vmul.f32 %v2580_v39, %v1559_v40 }
0x1c86   :  { %1563 = vrot.lane.b32.xlu0 %v1561_v42, %s2663_s21 }
0x1cf8   :  { %v1564_v43 = vpop.permute.xlu0 %1563 }
0x1cf9   :  { %v1566_v44 = vadd.f32 %v1564_v43, %v3048_v49 }
0x1cfb   :  { %2581 = vtanh.f32 %v1566_v44 }
0x1d08   :  { %v2582_v45 = vpop.eup %2581 }
0x1d09   :  { %1570 = vrot.lane.b32.xlu1 %v2582_v45, %s2664_s4 }
0x1d7b   :  { %v1571_v50 = vpop.permute.xlu1 %1570 }
0x1d7c   :  { %v1573_v52 = vmul.f32 %v1571_v50, %v1568_v46 }
0x1d7e   :  { %v3098_v53 = vadd.f32 %v1576_v51, %v1573_v52 }
0x1d80   :  { %v1583_v54 = vrot.slane %v3098_v53, 4  ;;  %v1687_v14 = vrot.slane %v3098_v53, 6 }
0x1d82   :  { %1584 = vrot.lane.b32.xlu0 %v1583_v54, %s2664_s4 }
0x1df4   :  { %v1585_v55 = vpop.permute.xlu0 %1584 }
0x1df5   :  { %2459 = vmatmul.mubr.msk.f32.vlgmr.msra.gmra.mxu1 %vm253_vm7, %v1585_v55 }
0x1df6   :  { %2473 = vmatpush3.msra.mxu1 %v2961_v23  ;;  %2480 = vmatprep.mubr.msk.f32.mxu1 %vm2662_vm1, %v2661_v1 }
0x1df7   :  { %2474 = vmatprep.subr.mxu1 %v2661_v1 }
0x1df8   :  { %2475 = vmatpush3.msra.mxu1 %v2966_v28 }
0x1df9   :  { %2476 = vmatprep.subr.mxu1 %v2661_v1 }
0x1dfa   :  { %2477 = vmatpush3.msra.mxu1 %v2974_v24 }
0x1dfb   :  { %2478 = vmatprep.subr.mxu1 %v2661_v1 }
0x1dfc   :  { %2479 = vmatpush3.msra.mxu1 %v2981_v8 }
0x1dfd   :  { %2494 = vmatprep.subr.mxu1 %v2661_v1 }
0x1eb5   :  { %v1654_v56 = vpop.f32.mrf.mxu1 }
0x1eb6   :  { %v1668_v58 = vadd.f32 %v1654_v56, %v3026_v41  ;;  %v1659_v60 = vrot.slane %v1654_v56, 2 }
0x1eb7   :  { %v2460_v59 = vpop.f32.mrf.mxu1 }
0x1eb8   :  { %v1670_v30 = vrot.slane %v1668_v58, 2  ;;  %v1661_v61 = vadd.f32 %v1659_v60, %v3048_v49 }
0x1eba   :  { %1671 = vrot.lane.b32.xlu1 %v1670_v30, %s2663_s21  ;;  %v2198_v62 = vmul.f32 -1.442695, %v1661_v61 }
0x1ebc   :  { %2583 = vpow2.f32 %v2198_v62 }
0x1ec9   :  { %v2584_v63 = vpop.eup %2583 }
0x1eca   :  { %v1665_v0 = vadd.f32 1.0, %v2584_v63 }
0x1ecc   :  { %2585 = vrcp.f32 %v1665_v0 }
0x1ed9   :  { %v2586_v2 = vpop.eup %2585 }
0x1eda   :  { %v1681_v13 = vsub.f32 1.0, %v2586_v2  ;;  %v1689_v16 = vmul.f32 %v2586_v2, %v1687_v14 }
0x1f2c   :  { %v1672_v3 = vpop.permute.xlu1 %1671 }
0x1f2d   :  { %v1674_v5 = vmul.f32 %v2586_v2, %v1672_v3 }
0x1f2f   :  { %1676 = vrot.lane.b32.xlu0 %v1674_v5, %s2663_s21 }
0x1fa1   :  { %v1677_v6 = vpop.permute.xlu0 %1676 }
0x1fa2   :  { %v1679_v9 = vadd.f32 %v1677_v6, %v3048_v49 }
0x1fa4   :  { %2587 = vtanh.f32 %v1679_v9 }
0x1fb1   :  { %v2588_v12 = vpop.eup %2587 }
0x1fb2   :  { %1683 = vrot.lane.b32.xlu1 %v2588_v12, %s2664_s4 }
0x2024   :  { %v1684_v15 = vpop.permute.xlu1 %1683 }
0x2025   :  { %v1686_v17 = vmul.f32 %v1684_v15, %v1681_v13 }
0x2027   :  { %v3120_v18 = vadd.f32 %v1689_v16, %v1686_v17 }
0x2029   :  { %v1696_v19 = vrot.slane %v3120_v18, 6 }
0x202b   :  { %1697 = vrot.lane.b32.xlu0 %v1696_v19, %s2664_s4 }
0x209d   :  { %v1698_v22 = vpop.permute.xlu0 %1697 }
0x209e   :  { %2470 = vmatmul.mubr.msk.f32.vlgmr.msra.gmra.mxu0 %vm253_vm7, %v1698_v22 }
0x209f   :  { %2484 = vmatpush3.msra.mxu0 %v2961_v23  ;;  %2491 = vmatprep.mubr.msk.f32.mxu0 %vm2662_vm1, %v2661_v1 }
0x20a0   :  { %2485 = vmatprep.subr.mxu0 %v2661_v1 }
0x20a1   :  { %2486 = vmatpush3.msra.mxu0 %v2966_v28 }
0x20a2   :  { %2487 = vmatprep.subr.mxu0 %v2661_v1 }
0x20a3   :  { %2488 = vmatpush3.msra.mxu0 %v2974_v24 }
0x20a4   :  { %2489 = vmatprep.subr.mxu0 %v2661_v1 }
0x20a5   :  { %2490 = vmatpush3.msra.mxu0 %v2981_v8 }
0x215e   :  { %v1767_v49 = vpop.f32.mrf.mxu0 }
0x215f   :  { %v1778_v20 = vadd.f32 %v1767_v49, %v3026_v41  ;;  %v1771_v21 = vadd.f32 %v1767_v49, %v3046_v47 }
0x2160   :  { %v2471_v7 = vpop.f32.mrf.mxu0 }
0x2161   :  { %1780 = vrot.lane.b32.xlu1 %v1778_v20, %s2663_s21  ;;  %v2200_v4 = vmul.f32 -1.442695, %v1771_v21 }
0x2163   :  { %2589 = vpow2.f32 %v2200_v4 }
0x2170   :  { %v2590_v57 = vpop.eup %2589 }
0x2171   :  { %v1775_v34 = vadd.f32 1.0, %v2590_v57 }
0x2173   :  { %2591 = vrcp.f32 %v1775_v34 }
0x2180   :  { %v2592_v25 = vpop.eup %2591 }
0x2181   :  { %v1790_v32 = vsub.f32 1.0, %v2592_v25  ;;  %v1797_v35 = vmul.f32 %v2592_v25, %v1696_v19 }
0x21d3   :  { %v1781_v10 = vpop.permute.xlu1 %1780 }
0x21d4   :  { %v1783_v27 = vmul.f32 %v2592_v25, %v1781_v10 }
0x21d6   :  { %1785 = vrot.lane.b32.xlu0 %v1783_v27, %s2663_s21 }
0x2248   :  { %v1786_v29 = vpop.permute.xlu0 %1785 }
0x2249   :  { %v1788_v11 = vadd.f32 %v1786_v29, %v3046_v47 }
0x224b   :  { %2593 = vtanh.f32 %v1788_v11 }
0x2258   :  { %v2594_v31 = vpop.eup %2593 }
0x2259   :  { %1792 = vrot.lane.b32.xlu1 %v2594_v31, %s2664_s4 }
0x22cb   :  { %v1793_v33 = vpop.permute.xlu1 %1792 }
0x22cc   :  { %v1795_v36 = vmul.f32 %v1793_v33, %v1790_v32 }
0x22ce   :  { %v1798_v37 = vadd.f32 %v1797_v35, %v1795_v36 }
0x22d0   :  { %1800 = vrot.lane.b32.xlu0 %v1798_v37, %s2664_s4  ;;  %v1905_v52 = vrot.slane %v1798_v37, 6 }
0x2342   :  { %v1801_v38 = vpop.permute.xlu0 %1800 }
0x2343   :  { %1803 = vst.msk [vmem:[%s3229_s10 + $0x8] sm:$0x3] %vm366_vm6, %v1801_v38  ;;  %2481 = vmatmul.mubr.msk.f32.vlgmr.msra.gmra.mxu1 %vm253_vm7, %v1801_v38 }
0x2344   :  { %2495 = vmatpush3.msra.mxu1 %v2961_v23  ;;  %2502 = vmatprep.mubr.msk.f32.mxu1 %vm2662_vm1, %v2661_v1 }
0x2345   :  { %2496 = vmatprep.subr.mxu1 %v2661_v1 }
0x2346   :  { %2497 = vmatpush3.msra.mxu1 %v2966_v28 }
0x2347   :  { %2498 = vmatprep.subr.mxu1 %v2661_v1 }
0x2348   :  { %2499 = vmatpush3.msra.mxu1 %v2974_v24 }
0x2349   :  { %2500 = vmatprep.subr.mxu1 %v2661_v1 }
0x234a   :  { %2501 = vmatpush3.msra.mxu1 %v2981_v8 }
0x2403   :  { %v1872_v39 = vpop.f32.mrf.mxu1 }
0x2404   :  { %v1886_v40 = vadd.f32 %v1872_v39, %v3026_v41  ;;  %v1877_v43 = vrot.slane %v1872_v39, 6 }
0x2405   :  { %v2482_v42 = vpop.f32.mrf.mxu1 }
0x2406   :  { %v1888_v23 = vrot.slane %v1886_v40, 6  ;;  %v1879_v44 = vadd.f32 %v1877_v43, %v3046_v47 }
0x2408   :  { %1889 = vrot.lane.b32.xlu1 %v1888_v23, %s2663_s21  ;;  %v2202_v45 = vmul.f32 -1.442695, %v1879_v44 }
0x240a   :  { %2595 = vpow2.f32 %v2202_v45 }
0x2417   :  { %v2596_v28 = vpop.eup %2595 }
0x2418   :  { %v1883_v46 = vadd.f32 1.0, %v2596_v28 }
0x241a   :  { %2597 = vrcp.f32 %v1883_v46 }
0x2427   :  { %v2598_v24 = vpop.eup %2597 }
0x2428   :  { %v1899_v54 = vsub.f32 1.0, %v2598_v24  ;;  %v1907_v58 = vmul.f32 %v2598_v24, %v1905_v52 }
0x247a   :  { %v1890_v48 = vpop.permute.xlu1 %1889 }
0x247b   :  { %v1892_v1 = vmul.f32 %v2598_v24, %v1890_v48 }
0x247d   :  { %1894 = vrot.lane.b32.xlu0 %v1892_v1, %s2663_s21 }
0x24ef   :  { %v1895_v8 = vpop.permute.xlu0 %1894 }
0x24f0   :  { %v1897_v50 = vadd.f32 %v1895_v8, %v3046_v47 }
0x24f2   :  { %2599 = vtanh.f32 %v1897_v50 }
0x24ff   :  { %v2600_v51 = vpop.eup %2599 }
0x2500   :  { %1901 = vrot.lane.b32.xlu1 %v2600_v51, %s2664_s4 }
0x2572   :  { %v1902_v55 = vpop.permute.xlu1 %1901 }
0x2573   :  { %v1904_v56 = vmul.f32 %v1902_v55, %v1899_v54 }
0x2575   :  { %v3161_v59 = vadd.f32 %v1907_v58, %v1904_v56 }
0x2577   :  { %v1914_v30 = vrot.slane %v3161_v59, 2  ;;  %v2018_v22 = vrot.slane %v3161_v59, 6 }
0x2579   :  { %1915 = vrot.lane.b32.xlu0 %v1914_v30, %s2664_s4 }
0x25eb   :  { %v1916_v60 = vpop.permute.xlu0 %1915 }
0x25ec   :  { %2492 = vmatmul.mubr.msk.f32.vlgmr.msra.gmra.mxu0 %vm253_vm7, %v1916_v60 }
0x26ac   :  { %v1985_v61 = vpop.f32.mrf.mxu0 }
0x26ad   :  { %v1999_v62 = vadd.f32 %v1985_v61, %v3026_v41  ;;  %v1990_v2 = vrot.slane %v1985_v61, 4 }
0x26ae   :  { %v2493_v63 = vpop.f32.mrf.mxu0 }
0x26af   :  { %v2001_v0 = vrot.slane %v1999_v62, 4  ;;  %v1992_v3 = vadd.f32 %v1990_v2, %v3046_v47 }
0x26b1   :  { %2002 = vrot.lane.b32.xlu1 %v2001_v0, %s2663_s21  ;;  %v2204_v5 = vmul.f32 -1.442695, %v1992_v3 }
0x26b3   :  { %2601 = vpow2.f32 %v2204_v5 }
0x26c0   :  { %v2602_v6 = vpop.eup %2601 }
0x26c1   :  { %v1996_v9 = vadd.f32 1.0, %v2602_v6 }
0x26c3   :  { %2603 = vrcp.f32 %v1996_v9 }
0x26d0   :  { %v2604_v12 = vpop.eup %2603 }
0x26d1   :  { %v2012_v19 = vsub.f32 1.0, %v2604_v12  ;;  %v2020_v20 = vmul.f32 %v2604_v12, %v2018_v22 }
0x2723   :  { %v2003_v13 = vpop.permute.xlu1 %2002 }
0x2724   :  { %v2005_v14 = vmul.f32 %v2604_v12, %v2003_v13 }
0x2726   :  { %2007 = vrot.lane.b32.xlu0 %v2005_v14, %s2663_s21 }
0x2798   :  { %v2008_v15 = vpop.permute.xlu0 %2007 }
0x2799   :  { %v2010_v16 = vadd.f32 %v2008_v15, %v3046_v47 }
0x279b   :  { %2605 = vtanh.f32 %v2010_v16 }
0x27a8   :  { %v2606_v17 = vpop.eup %2605 }
0x27a9   :  { %2014 = vrot.lane.b32.xlu1 %v2606_v17, %s2664_s4 }
0x281b   :  { %v2015_v49 = vpop.permute.xlu1 %2014 }
0x281c   :  { %v2017_v7 = vmul.f32 %v2015_v49, %v2012_v19 }
0x281e   :  { %v2021_v21 = vadd.f32 %v2020_v20, %v2017_v7 }
0x2820   :  { %v2027_v4 = vrot.slane %v2021_v21, 4 }
0x2822   :  { %2028 = vrot.lane.b32.xlu0 %v2027_v4, %s2664_s4 }
0x2894   :  { %v2029_v57 = vpop.permute.xlu0 %2028 }
0x2895   :  { %2503 = vmatmul.mubr.msk.f32.vlgmr.msra.gmra.mxu1 %vm253_vm7, %v2029_v57 }
0x2955   :  { %v2098_v34 = vpop.f32.mrf.mxu1 }
0x2956   :  { %v2112_v25 = vadd.f32 %v2098_v34, %v3026_v41  ;;  %v2103_v29 = vrot.slane %v2098_v34, 2 }
0x2957   :  { %v2504_v10 = vpop.f32.mrf.mxu1 }
0x2958   :  { %v2114_v27 = vrot.slane %v2112_v25, 2  ;;  %v2105_v11 = vadd.f32 %v2103_v29, %v3046_v47 }
0x295a   :  { %2115 = vrot.lane.b32.xlu1 %v2114_v27, %s2663_s21  ;;  %v2206_v31 = vmul.f32 -1.442695, %v2105_v11 }
0x295c   :  { %2607 = vpow2.f32 %v2206_v31 }
0x2969   :  { %v2608_v32 = vpop.eup %2607 }
0x296a   :  { %v2109_v33 = vadd.f32 1.0, %v2608_v32 }
0x296c   :  { %2609 = vrcp.f32 %v2109_v33 }
0x2979   :  { %v2610_v35 = vpop.eup %2609 }
0x29cc   :  { %v2116_v36 = vpop.permute.xlu1 %2115 }
0x29cd   :  { %v2118_v37 = vmul.f32 %v2610_v35, %v2116_v36 }
0x29cf   :  { %2120 = vrot.lane.b32.xlu0 %v2118_v37, %s2663_s21 }
0x29d3   :  { %1579 = vrot.lane.b32.xlu0 %v3098_v53, %s2664_s4  ;;  %v2125_v53 = vsub.f32 1.0, %v2610_v35 }
0x2a41   :  { %v2121_v41 = vpop.permute.xlu0 %2120 }
0x2a42   :  { %v2123_v38 = vadd.f32 %v2121_v41, %v3046_v47  ;;  %v2131_v47 = vrot.slane %v2021_v21, 6 }
0x2a44   :  { %2611 = vtanh.f32 %v2123_v38  ;;  %v2133_v23 = vmul.f32 %v2610_v35, %v2131_v47 }
0x2a45   :  { %v1580_v39 = vpop.permute.xlu0 %1579 }
0x2a46   :  { %1582 = vst.msk [vmem:[%s3229_s10] sm:$0x30] %vm591_vm10, %v1580_v39 }
0x2a51   :  { %v2612_v40 = vpop.eup %2611 }
0x2a52   :  { %2127 = vrot.lane.b32.xlu1 %v2612_v40, %s2664_s4 }
0x2a56   :  { %1466 = vrot.lane.b32.xlu1 %v3076_v26, %s2664_s4 }
0x2a5a   :  { %1692 = vrot.lane.b32.xlu1 %v3120_v18, %s2664_s4 }
0x2a5e   :  { %2023 = vrot.lane.b32.xlu1 %v2021_v21, %s2664_s4 }
0x2ac4   :  { %v2128_v42 = vpop.permute.xlu1 %2127 }
0x2ac5   :  { %v2130_v43 = vmul.f32 %v2128_v42, %v2125_v53 }
0x2ac7   :  { %v2134_v44 = vadd.f32 %v2133_v23, %v2130_v43 }
0x2ac8   :  { %v1467_v45 = vpop.permute.xlu1 %1466 }
0x2ac9   :  { %1469 = vst.msk [vmem:[%s3229_s10] sm:$0xc] %vm477_vm8, %v1467_v45  ;;  %2136 = vrot.lane.b32.xlu0 %v2134_v44, %s2664_s4 }
0x2acc   :  { %v1693_v26 = vpop.permute.xlu1 %1692 }
0x2acd   :  { %1695 = vst.msk [vmem:[%s3229_s10] sm:$0xc0] %vm705_vm9, %v1693_v26  ;;  %1910 = vrot.lane.b32.xlu0 %v3161_v59, %s2664_s4 }
0x2ad0   :  { %v2024_v18 = vpop.permute.xlu1 %2023 }
0x2ad1   :  { %2026 = vst.msk [vmem:[%s3229_s10 + $0x8] sm:$0x30] %vm591_vm10, %v2024_v18 }
0x2b3b   :  { %v2137_v28 = vpop.permute.xlu0 %2136 }
0x2b3c   :  { %2139 = vst.msk [vmem:[%s3229_s10 + $0x8] sm:$0xc0] %vm705_vm9, %v2137_v28  ;;  %2142 = vst.msk [vmem:[#allocation6 - $0x4] sm:$0xc0] %vm705_vm9, %v2137_v28 }
0x2b3d   :  { %2644 = shalt.err (!%p2641_p9)
}
0x2b3e   :  { %s2666_s4 = smov 32   ;;  %s2667_s30 = smov 2  }
0x2b3f   :  { %2156 = dma.vmem_to_hbm [thread:$0]  %s2151_s28, 64, %s3230_s11, [#allocation5], %s2666_s4, %s2666_s4, %s2667_s30   ;;  %v1911_v46 = vpop.permute.xlu0 %1910 }
0x2b40   :  { %1913 = vst.msk [vmem:[%s3229_s10 + $0x8] sm:$0xc] %vm477_vm8, %v1911_v46 }
0x2b41   :  { %2655 = dma.done.wait [#allocation5], 64  }
0x2b42   :  { %2656 = vsyncadd [#allocation5], 4294967232 }
0x2b43   :  { %2162 = vsyncpa [#allocation4], 1 }
0x2b44   :  { %2163 = vsyncpa [#allocation5], 1 }

</bundles_post_ra>
